<compile_context>
chip_gen: v7x
topology: tpu7x:2x2x1
jax: 0.10.0
libtpu: 0.0.40
codegen_flags: <defaults>
</compile_context>

<pallas_src>
import jax
import jax.numpy as jnp
from jax.experimental import pallas as pl
from jax.experimental.pallas import tpu as pltpu

HIDDEN_LAYER_SIZE = 512


def _ae_kernel(x_ref, w1_ref, w2_ref, emb_ref, rec_ref):
    # x_ref:  (TB, F)  bf16 tile of flattened input rows
    # w1_ref: (F, H)   fc1 weight, pre-transposed, bf16
    # w2_ref: (H, F)   fc2 weight, pre-transposed, bf16
    x = x_ref[...]

    # Encoder: relu(x @ W1t) -- bf16 MXU operands, f32 accumulation, f32 relu.
    emb_f32 = jnp.maximum(
        jnp.dot(x, w1_ref[...], preferred_element_type=jnp.float32), 0.0
    )
    emb_ref[...] = emb_f32.astype(emb_ref.dtype)

    # Decoder: sigmoid(emb @ W2t) -- cast emb to bf16 for the MXU, accumulate f32,
    # apply sigmoid in f32 (EUP), write f32.
    rec_f32 = jnp.dot(
        emb_f32.astype(w2_ref.dtype), w2_ref[...],
        preferred_element_type=jnp.float32,
    )
    rec_ref[...] = jax.nn.sigmoid(rec_f32).astype(rec_ref.dtype)


def prepare_weights(w1, w2, dtype=jnp.bfloat16):
    """One-time param prep: cast + transpose to the kernel's row-major layout.

    Args:
      w1: fc1 weight, shape (HIDDEN, in_features)  (PyTorch nn.Linear layout).
      w2: fc2 weight, shape (in_features, HIDDEN).
    Returns:
      (w1t (in_features, HIDDEN), w2t (HIDDEN, in_features)) in `dtype`.
    """
    hidden, in_features = w1.shape
    assert w2.shape == (in_features, hidden)
    w1t = jnp.asarray(w1).astype(dtype).T  # (F, H)
    w2t = jnp.asarray(w2).astype(dtype).T  # (H, F)
    return w1t, w2t


def pooling_embedder_ae_forward(x, w1t, w2t, *, tile_rows=256):
    """Forward pass of PoolingEmbedderAE.

    Args:
      x:   array whose trailing dims flatten to in_features; reshaped to
           (-1, in_features) exactly like x.view(-1, in_features).
      w1t: pre-transposed fc1 weight, shape (in_features, HIDDEN)  (see prepare_weights).
      w2t: pre-transposed fc2 weight, shape (HIDDEN, in_features).
      tile_rows: rows per grid step (multiple of 8; 256 keeps the MXU M dim full).
    Returns:
      (embedding (N, HIDDEN) f32, recons_x (N, in_features) f32)
    """
    in_features, hidden = w1t.shape
    assert w2t.shape == (hidden, in_features)

    x2d = x.reshape(-1, in_features).astype(w1t.dtype)
    n = x2d.shape[0]

    # Pad row count to a multiple of tile_rows; slice the outputs afterwards.
    n_pad = ((n + tile_rows - 1) // tile_rows) * tile_rows
    if n_pad != n:
        x2d = jnp.pad(x2d, ((0, n_pad - n), (0, 0)))

    grid = (n_pad // tile_rows,)
    w_itemsize = jnp.dtype(w1t.dtype).itemsize
    x_itemsize = jnp.dtype(x2d.dtype).itemsize

    # VMEM budget: double-buffered x/emb/rec tiles + double-buffered weight
    # blocks (2 weights), with 1.5x + 2 MiB headroom, clamped for v7x (64 MiB/core).
    io_bytes = 2 * tile_rows * (
        in_features * x_itemsize + hidden * 4 + in_features * 4
    )
    w_bytes = 2 * 2 * in_features * hidden * w_itemsize
    vmem_limit = min(int(1.5 * (io_bytes + w_bytes)) + (2 << 20), 48 * 1024 * 1024)

    emb, rec = pl.pallas_call(
        _ae_kernel,
        out_shape=(
            jax.ShapeDtypeStruct((n_pad, hidden), jnp.float32),
            jax.ShapeDtypeStruct((n_pad, in_features), jnp.float32),
        ),
        grid_spec=pltpu.PrefetchScalarGridSpec(
            num_scalar_prefetch=0,
            grid=grid,
            in_specs=[
                pl.BlockSpec((tile_rows, in_features), lambda i: (i, 0)),
                pl.BlockSpec((in_features, hidden), lambda i: (0, 0)),
                pl.BlockSpec((hidden, in_features), lambda i: (0, 0)),
            ],
            out_specs=[
                pl.BlockSpec((tile_rows, hidden), lambda i: (i, 0)),
                pl.BlockSpec((tile_rows, in_features), lambda i: (i, 0)),
            ],
        ),
        compiler_params=pltpu.CompilerParams(
            dimension_semantics=("parallel",),
            vmem_limit_bytes=vmem_limit,
        ),
    )(x2d, w1t, w2t)

    if n_pad != n:
        emb = emb[:n]
        rec = rec[:n]
    return emb, rec


if __name__ == "__main__":
    # Small, deterministic example consistent with the module:
    # in_features = 256, batch of 8 flattened rows.
    in_features = 256
    batch = 8

    key = jax.random.PRNGKey(0)
    kx, k1, k2 = jax.random.split(key, 3)

    x = jax.random.normal(kx, (batch, in_features), dtype=jnp.float32)
    # Deterministic synthetic weights (PyTorch nn.Linear layout: (out, in)).
    w1 = 0.02 * jax.random.normal(k1, (HIDDEN_LAYER_SIZE, in_features), dtype=jnp.float32)
    w2 = 0.02 * jax.random.normal(k2, (in_features, HIDDEN_LAYER_SIZE), dtype=jnp.float32)

    # One-time parameter prep (transpose + bf16 cast), hoisted out of the forward.
    w1t, w2t = prepare_weights(w1, w2)

    fwd = jax.jit(pooling_embedder_ae_forward, static_argnames=("tile_rows",))
    emb, rec = fwd(x, w1t, w2t)
    jax.block_until_ready((emb, rec))

    # Reference check in plain JAX f32 (same math as the PyTorch forward).
    emb_ref = jnp.maximum(x @ w1.T, 0.0)
    rec_ref = jax.nn.sigmoid(emb_ref @ w2.T)
    assert emb.shape == (batch, HIDDEN_LAYER_SIZE)
    assert rec.shape == (batch, in_features)
    # bf16 MXU operands with f32 accumulation -> loosened tolerance vs f32 ref.
    assert jnp.allclose(emb, emb_ref, atol=2e-2, rtol=2e-2)
    assert jnp.allclose(rec, rec_ref, atol=2e-2, rtol=2e-2)

    print("KERNEL_OK")
</pallas_src>

<mosaic_0001>
module attributes {stable_mosaic.version = 11 : i64} {
  func.func @_ae_kernel(%arg0: i32, %arg1: memref<256x256xbf16, #tpu.memory_space<vmem>>, %arg2: memref<256x512xbf16, #tpu.memory_space<vmem>>, %arg3: memref<512x256xbf16, #tpu.memory_space<vmem>>, %arg4: memref<256x512xf32, #tpu.memory_space<vmem>>, %arg5: memref<256x256xf32, #tpu.memory_space<vmem>>) attributes {dimension_semantics = [#tpu.dimension_semantics<parallel>], iteration_bounds = array<i64: 1>, scalar_prefetch = 0 : i64, scratch_operands = 0 : i64, tpu.core_type = #tpu.core_type<tc>, window_params = [{transform_indices = @transform_0, window_bounds = array<i64: 256, 256>}, {pipeline_mode = #tpu.pipeline_mode<synchronous>, transform_indices = @transform_1, window_bounds = array<i64: 256, 512>}, {pipeline_mode = #tpu.pipeline_mode<synchronous>, transform_indices = @transform_2, window_bounds = array<i64: 512, 256>}, {transform_indices = @transform_3, window_bounds = array<i64: 256, 512>}, {transform_indices = @transform_4, window_bounds = array<i64: 256, 256>}]} {
    %c0 = arith.constant 0 : index
    %c0_0 = arith.constant 0 : index
    %0 = vector.load %arg1[%c0, %c0_0] : memref<256x256xbf16, #tpu.memory_space<vmem>>, vector<256x256xbf16>
    %c0_1 = arith.constant 0 : index
    %c0_2 = arith.constant 0 : index
    %1 = vector.load %arg2[%c0_1, %c0_2] : memref<256x512xbf16, #tpu.memory_space<vmem>>, vector<256x512xbf16>
    %cst = arith.constant dense<0.000000e+00> : vector<256x512xf32>
    %2 = tpu.matmul %0, %1, %cst {dimension_numbers = #tpu.dot_dimension_numbers<[1], [0], [0], [1], [0, 0, 1, 1], [], []>} : vector<256x256xbf16>, vector<256x512xbf16>, vector<256x512xf32> -> vector<256x512xf32>
    %cst_3 = arith.constant 0.000000e+00 : f32
    %3 = vector.broadcast %cst_3 : f32 to vector<256x512xf32>
    %4 = arith.maximumf %2, %3 : vector<256x512xf32>
    %c0_4 = arith.constant 0 : index
    %c0_5 = arith.constant 0 : index
    %5 = vector.load %arg4[%c0_4, %c0_5] : memref<256x512xf32, #tpu.memory_space<vmem>>, vector<256x512xf32>
    tpu.vector_store %arg4[%c0_4, %c0_5], %4 {strides = array<i32>} : memref<256x512xf32, #tpu.memory_space<vmem>>, vector<256x512xf32>,
    %6 = arith.truncf %4 : vector<256x512xf32> to vector<256x512xbf16>
    %c0_6 = arith.constant 0 : index
    %c0_7 = arith.constant 0 : index
    %7 = vector.load %arg3[%c0_6, %c0_7] : memref<512x256xbf16, #tpu.memory_space<vmem>>, vector<512x256xbf16>
    %cst_8 = arith.constant dense<0.000000e+00> : vector<256x256xf32>
    %8 = tpu.matmul %6, %7, %cst_8 {dimension_numbers = #tpu.dot_dimension_numbers<[1], [0], [0], [1], [0, 0, 1, 1], [], []>} : vector<256x512xbf16>, vector<512x256xbf16>, vector<256x256xf32> -> vector<256x256xf32>
    %9 = arith.negf %8 : vector<256x256xf32>
    %10 = math.exp %9 : vector<256x256xf32>
    %cst_9 = arith.constant 1.000000e+00 : f32
    %11 = vector.broadcast %cst_9 : f32 to vector<256x256xf32>
    %12 = arith.addf %11, %10 : vector<256x256xf32>
    %13 = arith.divf %11, %12 : vector<256x256xf32>
    %c0_10 = arith.constant 0 : index
    %c0_11 = arith.constant 0 : index
    %14 = vector.load %arg5[%c0_10, %c0_11] : memref<256x256xf32, #tpu.memory_space<vmem>>, vector<256x256xf32>
    tpu.vector_store %arg5[%c0_10, %c0_11], %13 {strides = array<i32>} : memref<256x256xf32, #tpu.memory_space<vmem>>, vector<256x256xf32>,
    return
  }
  func.func @transform_0(%arg0: i32) -> (i32, i32) {
    %c0_i32 = arith.constant 0 : i32
    %c0_i32_0 = arith.constant 0 : i32
    return %arg0, %c0_i32 : i32, i32
  }
  func.func @transform_1(%arg0: i32) -> (i32, i32) {
    %c0_i32 = arith.constant 0 : i32
    %c0_i32_0 = arith.constant 0 : i32
    %c0_i32_1 = arith.constant 0 : i32
    return %c0_i32, %c0_i32_0 : i32, i32
  }
  func.func @transform_2(%arg0: i32) -> (i32, i32) {
    %c0_i32 = arith.constant 0 : i32
    %c0_i32_0 = arith.constant 0 : i32
    %c0_i32_1 = arith.constant 0 : i32
    return %c0_i32, %c0_i32_0 : i32, i32
  }
  func.func @transform_3(%arg0: i32) -> (i32, i32) {
    %c0_i32 = arith.constant 0 : i32
    %c0_i32_0 = arith.constant 0 : i32
    return %arg0, %c0_i32 : i32, i32
  }
  func.func @transform_4(%arg0: i32) -> (i32, i32) {
    %c0_i32 = arith.constant 0 : i32
    %c0_i32_0 = arith.constant 0 : i32
    return %arg0, %c0_i32 : i32, i32
  }
}

</mosaic_0001>

<bundles_post_ra>
// kernel: pooling_embedder_ae_forward.1
= control target key start
LH: loop header
LB: loop body
LE: loop exit
PB: predicated region body
PF: predicated region fallthrough
CT: control target
= control target key end

     0   :  { %10 = vsyncpa [#allocation3], 0  ;;  %s4231_s0 = inlined_call_operand.vmem [shape: bf16[256,256], index: 0, kind: input, shape index: {}]   ;;  %s4232_s1 = inlined_call_operand.hbm [shape: bf16[256,512], index: 1, kind: input, shape index: {}]   ;;  %s4233_s2 = inlined_call_operand.hbm [shape: bf16[512,256], index: 2, kind: input, shape index: {}]   ;;  %s4234_s3 = inlined_call_operand.vmem [shape: f32[256,512], index: 3, kind: output, shape index: {0}]   ;;  %s4235_s4 = inlined_call_operand.vmem [shape: f32[256,256], index: 4, kind: output, shape index: {1}]  }
   0x1   :  { %11 = vsyncpa [#allocation5], 0  ;;  %s3392_s15 = smov [#allocation2]   ;;  %s3344_s19 = scalar_lea.hbm %s4232_s1, 8192 }
   0x2   :  { %s19_s16 = sshll.u32 %s3392_s15, 4  ;;  %p3345_p0 = scmp.ne.s32.totalorder %s4232_s1, %s3344_s19  ;;  %s20_s16 = int_to_ptr.vmem [resolvable:$true] %s19_s16 }
   0x3   :  { %p3348_p1 = scmp.lt.u32.totalorder %s3344_s19, %s4232_s1 }
   0x5   :  { %p3350_p2 = pnand %p3348_p1, %p3345_p0 }
   0x7   :  { %3353 = shalt.err (!%p3350_p2)
}
   0x8   :  { %s3354_s24 = scalar_lea.vmem %s20_s16, 8192  ;;  %p3359_p4 = scmp.lt.s32.totalorder %s20_s16, %s20_s16 }
   0x9   :  { %p3355_p3 = scmp.ne.s32.totalorder %s20_s16, %s3354_s24  ;;  %p3360_p5 = scmp.lt.s32.totalorder %s3354_s24, %s3354_s24 }
   0xb   :  { %p3361_p6 = por %p3360_p5, %p3359_p4 }
   0xd   :  { %p3362_p7 = pnand %p3361_p6, %p3355_p3 }
   0xf   :  { %3365 = shalt.err (!%p3362_p7)
}
  0x10   :  { %s3393_s25 = smov 256   ;;  %s3394_s26 = smov 16  }
  0x11   :  { %25 = dma.hbm_to_vmem [thread:$0]  %s4232_s1, 8192, %s20_s16, [#allocation3], %s3393_s25, %s3393_s25, %s3394_s26  }
  0x12   :  { %s3395_s29 = smov [#allocation4]   ;;  %s3366_s7 = scalar_lea.hbm %s4233_s2, 8192 }
  0x13   :  { %s31_s30 = sshll.u32 %s3395_s29, 4  ;;  %p3367_p8 = scmp.ne.s32.totalorder %s4233_s2, %s3366_s7  ;;  %s32_s30 = int_to_ptr.vmem [resolvable:$true] %s31_s30 }
  0x14   :  { %p3370_p9 = scmp.lt.u32.totalorder %s3366_s7, %s4233_s2 }
  0x16   :  { %p3372_p10 = pnand %p3370_p9, %p3367_p8 }
  0x18   :  { %3375 = shalt.err (!%p3372_p10)
}
  0x19   :  { %s3376_s12 = scalar_lea.vmem %s32_s30, 8192  ;;  %p3381_p12 = scmp.lt.s32.totalorder %s32_s30, %s32_s30 }
  0x1a   :  { %p3377_p11 = scmp.ne.s32.totalorder %s32_s30, %s3376_s12  ;;  %p3382_p13 = scmp.lt.s32.totalorder %s3376_s12, %s3376_s12 }
  0x1c   :  { %p3383_p0 = por %p3382_p13, %p3381_p12 }
  0x1e   :  { %p3384_p1 = pnand %p3383_p0, %p3377_p11 }
  0x20   :  { %3387 = shalt.err (!%p3384_p1)
}
  0x21   :  { %s3396_s1 = smov 128   ;;  %s3397_s13 = smov 8  }
  0x22   :  { %37 = dma.hbm_to_vmem [thread:$0]  %s4233_s2, 8192, %s32_s30, [#allocation5], %s3396_s1, %s3396_s1, %s3397_s13  }
  0x23   :  { %3388 = dma.done.wait [#allocation3], 8192  }
  0x24   :  { %3389 = vsyncadd [#allocation3], 4294959104 }
  0x25   :  { %3390 = dma.done.wait [#allocation5], 8192  }
  0x26   :  { %3391 = vsyncadd [#allocation5], 4294959104  ;;  %v2848_v0 = vld [vmem:[#allocation2 + $0x4] ss:$16 sps:$4 sm:$0xff]   ;;  %v2850_v1 = vld [vmem:[#allocation2] ss:$16 sps:$4 sm:$0xff]  }
  0x27   :  { %620 = vmatprep.subr.bf16.mxu1 %v2848_v0  ;;  %v2851_v2 = vld [vmem:[#allocation2 + $0x24] ss:$16 sps:$4 sm:$0xff]   ;;  %v2853_v3 = vld [vmem:[#allocation2 + $0x20] ss:$16 sps:$4 sm:$0xff]   ;;  %v2901_v33 = vld [vmem:[#allocation2 + $0xc] ss:$16 sps:$4 sm:$0xff]  }
  0x28   :  { %621 = vmatpush1.bf16.msra.mxu1 %v2850_v1  ;;  %v2854_v4 = vld [vmem:[#allocation2 + $0x44] ss:$16 sps:$4 sm:$0xff]   ;;  %v2856_v5 = vld [vmem:[#allocation2 + $0x40] ss:$16 sps:$4 sm:$0xff]   ;;  %v2899_v35 = vld [vmem:[#allocation2 + $0x8] ss:$16 sps:$4 sm:$0xff]  }
  0x29   :  { %622 = vmatprep.subr.bf16.mxu1 %v2851_v2  ;;  %v2857_v6 = vld [vmem:[#allocation2 + $0x64] ss:$16 sps:$4 sm:$0xff]   ;;  %v2859_v7 = vld [vmem:[#allocation2 + $0x60] ss:$16 sps:$4 sm:$0xff]   ;;  %v2907_v37 = vld [vmem:[#allocation2 + $0x2c] ss:$16 sps:$4 sm:$0xff]  }
  0x2a   :  { %v2860_v8 = vld [vmem:[#allocation2 + $0x84] ss:$16 sps:$4 sm:$0xff]   ;;  %v2862_v9 = vld [vmem:[#allocation2 + $0x80] ss:$16 sps:$4 sm:$0xff]   ;;  %v2905_v38 = vld [vmem:[#allocation2 + $0x28] ss:$16 sps:$4 sm:$0xff]  }
  0x2b   :  { %v2863_v10 = vld [vmem:[#allocation2 + $0xa4] ss:$16 sps:$4 sm:$0xff]   ;;  %v2865_v11 = vld [vmem:[#allocation2 + $0xa0] ss:$16 sps:$4 sm:$0xff]   ;;  %v2913_v39 = vld [vmem:[#allocation2 + $0x4c] ss:$16 sps:$4 sm:$0xff]  }
  0x2c   :  { %623 = vmatpush1.bf16.msra.mxu1 %v2853_v3  ;;  %v2866_v12 = vld [vmem:[#allocation2 + $0xc4] ss:$16 sps:$4 sm:$0xff]   ;;  %v2868_v14 = vld [vmem:[#allocation2 + $0xc0] ss:$16 sps:$4 sm:$0xff]   ;;  %v2911_v42 = vld [vmem:[#allocation2 + $0x48] ss:$16 sps:$4 sm:$0xff]  }
  0x2d   :  { %624 = vmatprep.subr.bf16.mxu1 %v2854_v4  ;;  %v3450_v13 = vld [vmem:[%s4231_s0 + $0x4] ss:$8 sps:$4 sm:$0xff]   ;;  %v2871_v16 = vld [vmem:[#allocation2 + $0xe0] ss:$16 sps:$4 sm:$0xff]   ;;  %v3461_v36 = vld [vmem:[%s4231_s0 + $0x14] ss:$8 sps:$4 sm:$0xff]  }
  0x2e   :  { %v2869_v15 = vld [vmem:[#allocation2 + $0xe4] ss:$16 sps:$4 sm:$0xff]   ;;  %652 = vmatprep.mubr.bf16.mxu1 %v3450_v13  ;;  %v2874_v18 = vld [vmem:[#allocation2 + $0x100] ss:$16 sps:$4 sm:$0xff]   ;;  %v2919_v43 = vld [vmem:[#allocation2 + $0x6c] ss:$16 sps:$4 sm:$0xff]  }
  0x2f   :  { %v2872_v17 = vld [vmem:[#allocation2 + $0x104] ss:$16 sps:$4 sm:$0xff]   ;;  %v2877_v20 = vld [vmem:[#allocation2 + $0x120] ss:$16 sps:$4 sm:$0xff]   ;;  %v2917_v44 = vld [vmem:[#allocation2 + $0x68] ss:$16 sps:$4 sm:$0xff]  }
  0x30   :  { %625 = vmatpush1.bf16.msra.mxu1 %v2856_v5  ;;  %v2875_v19 = vld [vmem:[#allocation2 + $0x124] ss:$16 sps:$4 sm:$0xff]   ;;  %v2880_v22 = vld [vmem:[#allocation2 + $0x140] ss:$16 sps:$4 sm:$0xff]   ;;  %v2925_v45 = vld [vmem:[#allocation2 + $0x8c] ss:$16 sps:$4 sm:$0xff]  }
  0x31   :  { %626 = vmatprep.subr.bf16.mxu1 %v2857_v6  ;;  %v2878_v21 = vld [vmem:[#allocation2 + $0x144] ss:$16 sps:$4 sm:$0xff]   ;;  %v2883_v24 = vld [vmem:[#allocation2 + $0x160] ss:$16 sps:$4 sm:$0xff]   ;;  %v2923_v48 = vld [vmem:[#allocation2 + $0x88] ss:$16 sps:$4 sm:$0xff]  }
  0x32   :  { %v2881_v23 = vld [vmem:[#allocation2 + $0x164] ss:$16 sps:$4 sm:$0xff]   ;;  %v2886_v26 = vld [vmem:[#allocation2 + $0x180] ss:$16 sps:$4 sm:$0xff]   ;;  %v2931_v49 = vld [vmem:[#allocation2 + $0xac] ss:$16 sps:$4 sm:$0xff]  }
  0x33   :  { %v2884_v25 = vld [vmem:[#allocation2 + $0x184] ss:$16 sps:$4 sm:$0xff]   ;;  %v2889_v28 = vld [vmem:[#allocation2 + $0x1a0] ss:$16 sps:$4 sm:$0xff]   ;;  %v2929_v50 = vld [vmem:[#allocation2 + $0xa8] ss:$16 sps:$4 sm:$0xff]  }
  0x34   :  { %627 = vmatpush1.bf16.msra.mxu1 %v2859_v7  ;;  %v2887_v27 = vld [vmem:[#allocation2 + $0x1a4] ss:$16 sps:$4 sm:$0xff]   ;;  %v2892_v30 = vld [vmem:[#allocation2 + $0x1c0] ss:$16 sps:$4 sm:$0xff]   ;;  %v2937_v51 = vld [vmem:[#allocation2 + $0xcc] ss:$16 sps:$4 sm:$0xff]  }
  0x35   :  { %628 = vmatprep.subr.bf16.mxu1 %v2860_v8  ;;  %v2890_v29 = vld [vmem:[#allocation2 + $0x1c4] ss:$16 sps:$4 sm:$0xff]   ;;  %v2895_v32 = vld [vmem:[#allocation2 + $0x1e0] ss:$16 sps:$4 sm:$0xff]   ;;  %v2935_v54 = vld [vmem:[#allocation2 + $0xc8] ss:$16 sps:$4 sm:$0xff]  }
  0x36   :  { %v2893_v31 = vld [vmem:[#allocation2 + $0x1e4] ss:$16 sps:$4 sm:$0xff]   ;;  %v3456_v34 = vld [vmem:[%s4231_s0] ss:$8 sps:$4 sm:$0xff]   ;;  %v3468_v40 = vld [vmem:[%s4231_s0 + $0x10] ss:$8 sps:$4 sm:$0xff]  }
  0x37   :  { %v3473_v41 = vld [vmem:[%s4231_s0 + $0x24] ss:$8 sps:$4 sm:$0xff]   ;;  %v3480_v46 = vld [vmem:[%s4231_s0 + $0x20] ss:$8 sps:$4 sm:$0xff]   ;;  %v3485_v47 = vld [vmem:[%s4231_s0 + $0x34] ss:$8 sps:$4 sm:$0xff]  }
  0x38   :  { %629 = vmatpush1.bf16.msra.mxu1 %v2862_v9  ;;  %v3492_v52 = vld [vmem:[%s4231_s0 + $0x30] ss:$8 sps:$4 sm:$0xff]   ;;  %v3497_v53 = vld [vmem:[%s4231_s0 + $0x44] ss:$8 sps:$4 sm:$0xff]   ;;  %v2994_v57 = vld [vmem:[#allocation4] ss:$8 sps:$4 sm:$0xff]  }
  0x39   :  { %630 = vmatprep.subr.bf16.mxu1 %v2863_v10  ;;  %v2943_v55 = vld [vmem:[#allocation2 + $0xec] ss:$16 sps:$4 sm:$0xff]   ;;  %v2941_v58 = vld [vmem:[#allocation2 + $0xe8] ss:$16 sps:$4 sm:$0xff]  }
  0x3a   :  { %v2992_v56 = vld [vmem:[#allocation4 + $0x4] ss:$8 sps:$4 sm:$0xff]   ;;  %v3504_v60 = vld [vmem:[%s4231_s0 + $0x40] ss:$8 sps:$4 sm:$0xff]   ;;  %v3509_v61 = vld [vmem:[%s4231_s0 + $0x54] ss:$8 sps:$4 sm:$0xff]  }
  0x3b   :  { %v2949_v59 = vld [vmem:[#allocation2 + $0x10c] ss:$16 sps:$4 sm:$0xff]   ;;  %1710 = vmatprep.subr.bf16.mxu0 %v2992_v56  ;;  %v2947_v62 = vld [vmem:[#allocation2 + $0x108] ss:$16 sps:$4 sm:$0xff]  }
  0x3c   :  { %631 = vmatpush1.bf16.msra.mxu1 %v2865_v11  ;;  %1711 = vmatpush1.bf16.msra.mxu0 %v2994_v57  ;;  %v2955_v63 = vld [vmem:[#allocation2 + $0x12c] ss:$16 sps:$4 sm:$0xff]   ;;  %v2997_v1 = vld [vmem:[#allocation4 + $0x10] ss:$8 sps:$4 sm:$0xff]   ;;  %v3000_v5 = vld [vmem:[#allocation4 + $0x20] ss:$8 sps:$4 sm:$0xff]  }
  0x3d   :  { %632 = vmatprep.subr.bf16.mxu1 %v2866_v12  ;;  %v2995_v0 = vld [vmem:[#allocation4 + $0x14] ss:$8 sps:$4 sm:$0xff]   ;;  %v2998_v2 = vld [vmem:[#allocation4 + $0x24] ss:$8 sps:$4 sm:$0xff]   ;;  %v2953_v3 = vld [vmem:[#allocation2 + $0x128] ss:$16 sps:$4 sm:$0xff]  }
  0x3e   :  { %1712 = vmatprep.subr.bf16.mxu0 %v2995_v0  ;;  %v2961_v4 = vld [vmem:[#allocation2 + $0x14c] ss:$16 sps:$4 sm:$0xff]   ;;  %v3516_v6 = vld [vmem:[%s4231_s0 + $0x50] ss:$8 sps:$4 sm:$0xff]   ;;  %v2958_v56 = vld [vmem:[%s4231_s0 + $0xa0] ss:$8 sps:$4 sm:$0xff]  }
  0x3f   :  { %v3521_v7 = vld [vmem:[%s4231_s0 + $0x64] ss:$8 sps:$4 sm:$0xff]   ;;  %v2959_v8 = vld [vmem:[#allocation2 + $0x148] ss:$16 sps:$4 sm:$0xff]   ;;  %v3001_v10 = vld [vmem:[#allocation4 + $0x34] ss:$8 sps:$4 sm:$0xff]  }
  0x40   :  { %633 = vmatpush1.bf16.msra.mxu1 %v2868_v14  ;;  %1713 = vmatpush1.bf16.msra.mxu0 %v2997_v1  ;;  %v2967_v9 = vld [vmem:[#allocation2 + $0x16c] ss:$16 sps:$4 sm:$0xff]   ;;  %v3003_v11 = vld [vmem:[#allocation4 + $0x30] ss:$8 sps:$4 sm:$0xff]  }
  0x41   :  { %634 = vmatprep.subr.bf16.mxu1 %v2869_v15  ;;  %1714 = vmatprep.subr.bf16.mxu0 %v2998_v2  ;;  %v3004_v12 = vld [vmem:[#allocation4 + $0x44] ss:$8 sps:$4 sm:$0xff]   ;;  %v2965_v14 = vld [vmem:[#allocation2 + $0x168] ss:$16 sps:$4 sm:$0xff]   ;;  %v2962_v57 = vld [vmem:[%s4231_s0 + $0xb4] ss:$8 sps:$4 sm:$0xff]  }
  0x42   :  { %v2973_v15 = vld [vmem:[#allocation2 + $0x18c] ss:$16 sps:$4 sm:$0xff]   ;;  %v2964_v0 = vld [vmem:[%s4231_s0 + $0xb0] ss:$8 sps:$4 sm:$0xff]  }
  0x43   :  { %v2968_v1 = vld [vmem:[%s4231_s0 + $0xc4] ss:$8 sps:$4 sm:$0xff]   ;;  %v3037_v2 = vld [vmem:[#allocation4 + $0xf4] ss:$8 sps:$4 sm:$0xff]  }
  0x44   :  { %635 = vmatpush1.bf16.msra.mxu1 %v2871_v16  ;;  %1715 = vmatpush1.bf16.msra.mxu0 %v3000_v5  ;;  %v3006_v16 = vld [vmem:[#allocation4 + $0x40] ss:$8 sps:$4 sm:$0xff]   ;;  %v3593_v5 = vld [vmem:[%s4231_s0 + $0xd4] ss:$8 sps:$4 sm:$0xff]  }
  0x45   :  { %636 = vmatprep.subr.bf16.mxu1 %v2872_v17  ;;  %1716 = vmatprep.subr.bf16.mxu0 %v3001_v10  ;;  %v3528_v17 = vld [vmem:[%s4231_s0 + $0x60] ss:$8 sps:$4 sm:$0xff]   ;;  %v3605_v10 = vld [vmem:[%s4231_s0 + $0xe4] ss:$8 sps:$4 sm:$0xff]  }
  0x48   :  { %637 = vmatpush1.bf16.msra.mxu1 %v2874_v18  ;;  %1717 = vmatpush1.bf16.msra.mxu0 %v3003_v11  ;;  %v3533_v18 = vld [vmem:[%s4231_s0 + $0x74] ss:$8 sps:$4 sm:$0xff]   ;;  %v3612_v11 = vld [vmem:[%s4231_s0 + $0xe0] ss:$8 sps:$4 sm:$0xff]  }
  0x49   :  { %638 = vmatprep.subr.bf16.mxu1 %v2875_v19  ;;  %1718 = vmatprep.subr.bf16.mxu0 %v3004_v12  ;;  %v2971_v19 = vld [vmem:[#allocation2 + $0x188] ss:$16 sps:$4 sm:$0xff]   ;;  %v3617_v12 = vld [vmem:[%s4231_s0 + $0xf4] ss:$8 sps:$4 sm:$0xff]  }
  0x4c   :  { %639 = vmatpush1.bf16.msra.mxu1 %v2877_v20  ;;  %v2979_v20 = vld [vmem:[#allocation2 + $0x1ac] ss:$16 sps:$4 sm:$0xff]   ;;  %1719 = vmatpush1.bf16.msra.mxu0 %v3006_v16 }
  0x4d   :  { %640 = vmatprep.subr.bf16.mxu1 %v2878_v21  ;;  %v3007_v21 = vld [vmem:[#allocation4 + $0x54] ss:$8 sps:$4 sm:$0xff]  }
  0x4e   :  { %1720 = vmatprep.subr.bf16.mxu0 %v3007_v21 }
  0x50   :  { %641 = vmatpush1.bf16.msra.mxu1 %v2880_v22  ;;  %v3009_v22 = vld [vmem:[#allocation4 + $0x50] ss:$8 sps:$4 sm:$0xff]  }
  0x51   :  { %642 = vmatprep.subr.bf16.mxu1 %v2881_v23  ;;  %v3010_v23 = vld [vmem:[#allocation4 + $0x64] ss:$8 sps:$4 sm:$0xff]   ;;  %1721 = vmatpush1.bf16.msra.mxu0 %v3009_v22 }
  0x52   :  { %1722 = vmatprep.subr.bf16.mxu0 %v3010_v23  ;;  %v3048_v22 = vld [vmem:[#allocation4 + $0x124] ss:$8 sps:$4 sm:$0xff]  }
  0x54   :  { %643 = vmatpush1.bf16.msra.mxu1 %v2883_v24  ;;  %v2977_v24 = vld [vmem:[#allocation2 + $0x1a8] ss:$16 sps:$4 sm:$0xff]  }
  0x55   :  { %644 = vmatprep.subr.bf16.mxu1 %v2884_v25  ;;  %v2985_v25 = vld [vmem:[#allocation2 + $0x1cc] ss:$16 sps:$4 sm:$0xff]  }
  0x58   :  { %645 = vmatpush1.bf16.msra.mxu1 %v2886_v26  ;;  %v3012_v26 = vld [vmem:[#allocation4 + $0x60] ss:$8 sps:$4 sm:$0xff]  }
  0x59   :  { %646 = vmatprep.subr.bf16.mxu1 %v2887_v27  ;;  %v3540_v27 = vld [vmem:[%s4231_s0 + $0x70] ss:$8 sps:$4 sm:$0xff]   ;;  %1723 = vmatpush1.bf16.msra.mxu0 %v3012_v26  ;;  %v3046_v26 = vld [vmem:[#allocation4 + $0x120] ss:$8 sps:$4 sm:$0xff]  }
  0x5c   :  { %647 = vmatpush1.bf16.msra.mxu1 %v2889_v28  ;;  %v3545_v28 = vld [vmem:[%s4231_s0 + $0x84] ss:$8 sps:$4 sm:$0xff]  }
  0x5d   :  { %648 = vmatprep.subr.bf16.mxu1 %v2890_v29  ;;  %v2983_v29 = vld [vmem:[#allocation2 + $0x1c8] ss:$16 sps:$4 sm:$0xff]  }
  0x60   :  { %649 = vmatpush1.bf16.msra.mxu1 %v2892_v30  ;;  %v2991_v30 = vld [vmem:[#allocation2 + $0x1ec] ss:$16 sps:$4 sm:$0xff]  }
  0x61   :  { %650 = vmatprep.subr.bf16.mxu1 %v2893_v31  ;;  %v3013_v31 = vld [vmem:[#allocation4 + $0x74] ss:$8 sps:$4 sm:$0xff]  }
  0x62   :  { %1724 = vmatprep.subr.bf16.mxu0 %v3013_v31 }
  0x64   :  { %651 = vmatpush1.bf16.msra.mxu1 %v2895_v32  ;;  %v3015_v32 = vld [vmem:[#allocation4 + $0x70] ss:$8 sps:$4 sm:$0xff]  }
  0x65   :  { %813 = vmatprep.subr.bf16.mxu1 %v2901_v33  ;;  %v3016_v33 = vld [vmem:[#allocation4 + $0x84] ss:$8 sps:$4 sm:$0xff]   ;;  %1725 = vmatpush1.bf16.msra.mxu0 %v3015_v32 }
  0x66   :  { %1726 = vmatprep.subr.bf16.mxu0 %v3016_v33  ;;  %v3049_v33 = vld [vmem:[#allocation4 + $0x130] ss:$8 sps:$4 sm:$0xff]  }
  0x67   :  { %653 = vmatmul.mubr.bf16.vlgmr.msra.gmra.mrb[0].mxu1 %v3456_v34 }
  0x68   :  { %814 = vmatpush1.bf16.msra.mxu1 %v2899_v35  ;;  %662 = vmatprep.mubr.bf16.mxu1 %v3461_v36  ;;  %v2989_v35 = vld [vmem:[#allocation2 + $0x1e8] ss:$16 sps:$4 sm:$0xff]  }
  0x69   :  { %815 = vmatprep.subr.bf16.mxu1 %v2907_v37  ;;  %v3018_v37 = vld [vmem:[#allocation4 + $0x80] ss:$8 sps:$4 sm:$0xff]  }
  0x6a   :  { %1727 = vmatpush1.bf16.msra.mxu0 %v3018_v37 }
  0x6c   :  { %816 = vmatpush1.bf16.msra.mxu1 %v2905_v38  ;;  %v3552_v38 = vld [vmem:[%s4231_s0 + $0x80] ss:$8 sps:$4 sm:$0xff]  }
  0x6d   :  { %817 = vmatprep.subr.bf16.mxu1 %v2913_v39  ;;  %v3557_v39 = vld [vmem:[%s4231_s0 + $0x94] ss:$8 sps:$4 sm:$0xff]  }
  0x6f   :  { %663 = vmatmul.mubr.bf16.gmra.mrb[4].mxu1 %v3468_v40 }
  0x70   :  { %672 = vmatprep.mubr.bf16.mxu1 %v3473_v41  ;;  %818 = vmatpush1.bf16.msra.mxu1 %v2911_v42  ;;  %v3019_v42 = vld [vmem:[#allocation4 + $0x94] ss:$8 sps:$4 sm:$0xff]  }
  0x71   :  { %819 = vmatprep.subr.bf16.mxu1 %v2919_v43  ;;  %v3021_v43 = vld [vmem:[#allocation4 + $0x90] ss:$8 sps:$4 sm:$0xff]   ;;  %1728 = vmatprep.subr.bf16.mxu0 %v3019_v42 }
  0x72   :  { %1729 = vmatpush1.bf16.msra.mxu0 %v3021_v43 }
  0x74   :  { %820 = vmatpush1.bf16.msra.mxu1 %v2917_v44  ;;  %v3022_v44 = vld [vmem:[#allocation4 + $0xa4] ss:$8 sps:$4 sm:$0xff]  }
  0x75   :  { %821 = vmatprep.subr.bf16.mxu1 %v2925_v45  ;;  %v3024_v45 = vld [vmem:[#allocation4 + $0xa0] ss:$8 sps:$4 sm:$0xff]   ;;  %1730 = vmatprep.subr.bf16.mxu0 %v3022_v44 }
  0x76   :  { %1731 = vmatpush1.bf16.msra.mxu0 %v3024_v45  ;;  %v3052_v44 = vld [vmem:[#allocation4 + $0x140] ss:$8 sps:$4 sm:$0xff]   ;;  %v3057_v45 = vld [vmem:[#allocation4 + $0x154] ss:$8 sps:$4 sm:$0xff]  }
  0x77   :  { %673 = vmatmul.mubr.bf16.gmra.mrb[8].mxu1 %v3480_v46 }
  0x78   :  { %682 = vmatprep.mubr.bf16.mxu1 %v3485_v47  ;;  %822 = vmatpush1.bf16.msra.mxu1 %v2923_v48  ;;  %v3564_v48 = vld [vmem:[%s4231_s0 + $0x90] ss:$8 sps:$4 sm:$0xff]  }
  0x79   :  { %823 = vmatprep.subr.bf16.mxu1 %v2931_v49  ;;  %v3569_v49 = vld [vmem:[%s4231_s0 + $0xa4] ss:$8 sps:$4 sm:$0xff]  }
  0x7c   :  { %824 = vmatpush1.bf16.msra.mxu1 %v2929_v50  ;;  %v3025_v50 = vld [vmem:[#allocation4 + $0xb4] ss:$8 sps:$4 sm:$0xff]  }
  0x7d   :  { %825 = vmatprep.subr.bf16.mxu1 %v2937_v51  ;;  %v3027_v51 = vld [vmem:[#allocation4 + $0xb0] ss:$8 sps:$4 sm:$0xff]   ;;  %1732 = vmatprep.subr.bf16.mxu0 %v3025_v50 }
  0x7e   :  { %1733 = vmatpush1.bf16.msra.mxu0 %v3027_v51 }
  0x7f   :  { %683 = vmatmul.mubr.bf16.gmra.mrb[12].mxu1 %v3492_v52 }
  0x80   :  { %692 = vmatprep.mubr.bf16.mxu1 %v3497_v53  ;;  %826 = vmatpush1.bf16.msra.mxu1 %v2935_v54  ;;  %v3028_v54 = vld [vmem:[#allocation4 + $0xc4] ss:$8 sps:$4 sm:$0xff]  }
  0x81   :  { %827 = vmatprep.subr.bf16.mxu1 %v2943_v55  ;;  %v3030_v55 = vld [vmem:[#allocation4 + $0xc0] ss:$8 sps:$4 sm:$0xff]   ;;  %1734 = vmatprep.subr.bf16.mxu0 %v3028_v54 }
  0x82   :  { %1735 = vmatpush1.bf16.msra.mxu0 %v3030_v55  ;;  %v3055_v55 = vld [vmem:[#allocation4 + $0x150] ss:$8 sps:$4 sm:$0xff]  }
  0x84   :  { %828 = vmatpush1.bf16.msra.mxu1 %v2941_v58  ;;  %v3031_v58 = vld [vmem:[#allocation4 + $0xd4] ss:$8 sps:$4 sm:$0xff]  }
  0x85   :  { %829 = vmatprep.subr.bf16.mxu1 %v2949_v59  ;;  %v3033_v59 = vld [vmem:[#allocation4 + $0xd0] ss:$8 sps:$4 sm:$0xff]   ;;  %1736 = vmatprep.subr.bf16.mxu0 %v3031_v58  ;;  %v3060_v58 = vld [vmem:[#allocation4 + $0x164] ss:$8 sps:$4 sm:$0xff]  }
  0x86   :  { %1737 = vmatpush1.bf16.msra.mxu0 %v3033_v59 }
  0x87   :  { %693 = vmatmul.mubr.bf16.gmra.mrb[16].mxu1 %v3504_v60 }
  0x88   :  { %702 = vmatprep.mubr.bf16.mxu1 %v3509_v61  ;;  %830 = vmatpush1.bf16.msra.mxu1 %v2947_v62  ;;  %v3034_v62 = vld [vmem:[#allocation4 + $0xe4] ss:$8 sps:$4 sm:$0xff]  }
  0x89   :  { %831 = vmatprep.subr.bf16.mxu1 %v2955_v63  ;;  %v3036_v63 = vld [vmem:[#allocation4 + $0xe0] ss:$8 sps:$4 sm:$0xff]   ;;  %1738 = vmatprep.subr.bf16.mxu0 %v3034_v62 }
  0x8a   :  { %1739 = vmatpush1.bf16.msra.mxu0 %v3036_v63 }
  0x8b   :  { %1740 = vmatprep.subr.bf16.mxu0 %v3037_v2 }
  0x8c   :  { %832 = vmatpush1.bf16.msra.mxu1 %v2953_v3  ;;  %v3039_v3 = vld [vmem:[#allocation4 + $0xf0] ss:$8 sps:$4 sm:$0xff]  }
  0x8d   :  { %833 = vmatprep.subr.bf16.mxu1 %v2961_v4  ;;  %v3588_v4 = vld [vmem:[%s4231_s0 + $0xc0] ss:$8 sps:$4 sm:$0xff]  }
  0x8e   :  { %1741 = vmatpush1.bf16.msra.mxu0 %v3039_v3 }
  0x8f   :  { %703 = vmatmul.mubr.bf16.gmra.mrb[20].mxu1 %v3516_v6 }
  0x90   :  { %712 = vmatprep.mubr.bf16.mxu1 %v3521_v7  ;;  %834 = vmatpush1.bf16.msra.mxu1 %v2959_v8  ;;  %v3042_v8 = vld [vmem:[#allocation4 + $0x104] ss:$8 sps:$4 sm:$0xff]  }
  0x91   :  { %835 = vmatprep.subr.bf16.mxu1 %v2967_v9  ;;  %1903 = vmatprep.subr.bf16.mxu0 %v3042_v8  ;;  %v3600_v9 = vld [vmem:[%s4231_s0 + $0xd0] ss:$8 sps:$4 sm:$0xff]  }
  0x94   :  { %836 = vmatpush1.bf16.msra.mxu1 %v2965_v14  ;;  %v3624_v14 = vld [vmem:[%s4231_s0 + $0xf0] ss:$8 sps:$4 sm:$0xff]  }
  0x95   :  { %837 = vmatprep.subr.bf16.mxu1 %v2973_v15 }
  0x97   :  { %713 = vmatmul.mubr.bf16.gmra.mrb[24].mxu1 %v3528_v17 }
  0x98   :  { %722 = vmatprep.mubr.bf16.mxu1 %v3533_v18  ;;  %838 = vmatpush1.bf16.msra.mxu1 %v2971_v19  ;;  %v3043_v19 = vld [vmem:[#allocation4 + $0x110] ss:$8 sps:$4 sm:$0xff]  }
  0x99   :  { %839 = vmatprep.subr.bf16.mxu1 %v2979_v20 }
  0x9c   :  { %840 = vmatpush1.bf16.msra.mxu1 %v2977_v24 }
  0x9d   :  { %841 = vmatprep.subr.bf16.mxu1 %v2985_v25 }
  0x9f   :  { %723 = vmatmul.mubr.bf16.gmra.mrb[28].mxu1 %v3540_v27 }
  0xa0   :  { %732 = vmatprep.mubr.bf16.mxu1 %v3545_v28  ;;  %842 = vmatpush1.bf16.msra.mxu1 %v2983_v29 }
  0xa1   :  { %843 = vmatprep.subr.bf16.mxu1 %v2991_v30 }
  0xa4   :  { %844 = vmatpush1.bf16.msra.mxu1 %v2989_v35 }
  0xa7   :  { %733 = vmatmul.mubr.bf16.gmra.mrb[32].mxu1 %v3552_v38 }
  0xa8   :  { %742 = vmatprep.mubr.bf16.mxu1 %v3557_v39 }
  0xaf   :  { %743 = vmatmul.mubr.bf16.gmra.mrb[36].mxu1 %v3564_v48 }
  0xb0   :  { %752 = vmatprep.mubr.bf16.mxu1 %v3569_v49 }
  0xb7   :  { %753 = vmatmul.mubr.bf16.gmra.mrb[40].mxu1 %v2958_v56 }
  0xb8   :  { %762 = vmatprep.mubr.bf16.mxu1 %v2962_v57 }
  0xbf   :  { %763 = vmatmul.mubr.bf16.gmra.mrb[44].mxu1 %v2964_v0 }
  0xc0   :  { %772 = vmatprep.mubr.bf16.mxu1 %v2968_v1 }
  0xc7   :  { %773 = vmatmul.mubr.bf16.gmra.mrb[48].mxu1 %v3588_v4 }
  0xc8   :  { %782 = vmatprep.mubr.bf16.mxu1 %v3593_v5 }
  0xcf   :  { %783 = vmatmul.mubr.bf16.gmra.mrb[52].mxu1 %v3600_v9 }
  0xd0   :  { %792 = vmatprep.mubr.bf16.mxu1 %v3605_v10 }
  0xd7   :  { %793 = vmatmul.mubr.bf16.gmra.mrb[56].mxu1 %v3612_v11 }
  0xd8   :  { %802 = vmatprep.mubr.bf16.mxu1 %v3617_v12 }
  0xdf   :  { %803 = vmatmul.mubr.bf16.gmra.mrb[60].mxu1 %v3624_v14 }
  0xe0   :  { %845 = vmatprep.mubr.bf16.mxu1 %v3450_v13 }
  0xe7   :  { %846 = vmatmul.mubr.bf16.vlgmr.msra.gmra.mrb[64].mxu1 %v3456_v34 }
  0xe8   :  { %855 = vmatprep.mubr.bf16.mxu1 %v3461_v36 }
  0xef   :  { %856 = vmatmul.mubr.bf16.gmra.mrb[68].mxu1 %v3468_v40 }
  0xf0   :  { %865 = vmatprep.mubr.bf16.mxu1 %v3473_v41 }
  0xf7   :  { %866 = vmatmul.mubr.bf16.gmra.mrb[72].mxu1 %v3480_v46 }
  0xf8   :  { %875 = vmatprep.mubr.bf16.mxu1 %v3485_v47 }
  0xff   :  { %876 = vmatmul.mubr.bf16.gmra.mrb[76].mxu1 %v3492_v52 }
 0x100   :  { %885 = vmatprep.mubr.bf16.mxu1 %v3497_v53 }
 0x107   :  { %886 = vmatmul.mubr.bf16.gmra.mrb[80].mxu1 %v3504_v60 }
 0x108   :  { %895 = vmatprep.mubr.bf16.mxu1 %v3509_v61  ;;  %v3040_v61 = vld [vmem:[#allocation4 + $0x100] ss:$8 sps:$4 sm:$0xff]  }
 0x10f   :  { %896 = vmatmul.mubr.bf16.gmra.mrb[84].mxu1 %v3516_v6  ;;  %v3045_v6 = vld [vmem:[#allocation4 + $0x114] ss:$8 sps:$4 sm:$0xff]  }
 0x110   :  { %905 = vmatprep.mubr.bf16.mxu1 %v3521_v7 }
 0x117   :  { %906 = vmatmul.mubr.bf16.gmra.mrb[88].mxu1 %v3528_v17 }
 0x118   :  { %915 = vmatprep.mubr.bf16.mxu1 %v3533_v18 }
 0x11f   :  { %916 = vmatmul.mubr.bf16.gmra.mrb[92].mxu1 %v3540_v27  ;;  %v3051_v27 = vld [vmem:[#allocation4 + $0x134] ss:$8 sps:$4 sm:$0xff]  }
 0x120   :  { %925 = vmatprep.mubr.bf16.mxu1 %v3545_v28 }
 0x127   :  { %926 = vmatmul.mubr.bf16.gmra.mrb[96].mxu1 %v3552_v38  ;;  %v3054_v38 = vld [vmem:[#allocation4 + $0x144] ss:$8 sps:$4 sm:$0xff]  }
 0x128   :  { %935 = vmatprep.mubr.bf16.mxu1 %v3557_v39 }
 0x12f   :  { %936 = vmatmul.mubr.bf16.gmra.mrb[100].mxu1 %v3564_v48 }
 0x130   :  { %945 = vmatprep.mubr.bf16.mxu1 %v3569_v49 }
 0x137   :  { %946 = vmatmul.mubr.bf16.gmra.mrb[104].mxu1 %v2958_v56 }
 0x138   :  { %955 = vmatprep.mubr.bf16.mxu1 %v2962_v57 }
 0x13a   :  { %v654_v13 = vpop.f32.mrb[0].mxu1 }
 0x13b   :  { %v1006_v34 = vmax.f32 %v654_v13, 0.0  ;;  %v656_v36 = vpop.f32.mrb[1].mxu1 }
 0x13c   :  { %v1007_v40 = vmax.f32 %v656_v36, 0.0  ;;  %v658_v41 = vpop.f32.mrb[2].mxu1 }
 0x13d   :  { %1134 = vst [vmem:[%s4234_s3] sm:$0xff] %v1006_v34  ;;  %v1010_v46 = vmax.f32 %v658_v41, 0.0  ;;  %v660_v47 = vpop.f32.mrb[3].mxu1  ;;  %v3069_v41 = vld [vmem:[#allocation4 + $0x194] ss:$8 sps:$4 sm:$0xff]  }
 0x13e   :  { %1135 = vst [vmem:[%s4234_s3 + $0x8] sm:$0xff] %v1007_v40  ;;  %v1011_v52 = vmax.f32 %v660_v47, 0.0 }
 0x13f   :  { %1138 = vst [vmem:[%s4234_s3 + $0x20] sm:$0xff] %v1010_v46  ;;  %v1262_v53 = vpack.c.bf16 %v1010_v46, %v1006_v34  ;;  %956 = vmatmul.mubr.bf16.gmra.mrb[108].mxu1 %v2964_v0  ;;  %v3058_v0 = vld [vmem:[#allocation4 + $0x160] ss:$8 sps:$4 sm:$0xff]  }
 0x140   :  { %1139 = vst [vmem:[%s4234_s3 + $0x28] sm:$0xff] %v1011_v52  ;;  %v1263_v60 = vpack.c.bf16 %v1011_v52, %v1007_v40  ;;  %965 = vmatprep.mubr.bf16.mxu1 %v2968_v1  ;;  %v3063_v1 = vld [vmem:[#allocation4 + $0x174] ss:$8 sps:$4 sm:$0xff]   ;;  %v3064_v40 = vld [vmem:[#allocation4 + $0x180] ss:$8 sps:$4 sm:$0xff]  }
 0x142   :  { %v664_v7 = vpop.f32.mrb[4].mxu1  ;;  %1742 = vmatprep.mubr.bf16.mxu0 %v1263_v60 }
 0x143   :  { %v1014_v15 = vmax.f32 %v664_v7, 0.0  ;;  %v666_v16 = vpop.f32.mrb[5].mxu1  ;;  %1743 = vmatmul.mubr.bf16.vlgmr.msra.gmra.mrb[0].mxu0 %v1262_v53  ;;  %v3072_v7 = vld [vmem:[#allocation4 + $0x1a4] ss:$8 sps:$4 sm:$0xff]  }
 0x144   :  { %v1015_v17 = vmax.f32 %v666_v16, 0.0  ;;  %v668_v18 = vpop.f32.mrb[6].mxu1  ;;  %1904 = vmatpush1.bf16.msra.mxu0 %v3040_v61  ;;  %v3067_v61 = vld [vmem:[#allocation4 + $0x190] ss:$8 sps:$4 sm:$0xff]  }
 0x145   :  { %1142 = vst [vmem:[%s4234_s3 + $0x40] sm:$0xff] %v1014_v15  ;;  %v1018_v20 = vmax.f32 %v668_v18, 0.0  ;;  %v670_v21 = vpop.f32.mrb[7].mxu1  ;;  %1905 = vmatprep.subr.bf16.mxu0 %v3045_v6  ;;  %v3070_v18 = vld [vmem:[#allocation4 + $0x1a0] ss:$8 sps:$4 sm:$0xff]  }
 0x146   :  { %1143 = vst [vmem:[%s4234_s3 + $0x48] sm:$0xff] %v1015_v17  ;;  %v1019_v23 = vmax.f32 %v670_v21, 0.0 }
 0x147   :  { %1146 = vst [vmem:[%s4234_s3 + $0x60] sm:$0xff] %v1018_v20  ;;  %v1266_v24 = vpack.c.bf16 %v1018_v20, %v1014_v15  ;;  %966 = vmatmul.mubr.bf16.gmra.mrb[112].mxu1 %v3588_v4 }
 0x148   :  { %1147 = vst [vmem:[%s4234_s3 + $0x68] sm:$0xff] %v1019_v23  ;;  %v1267_v25 = vpack.c.bf16 %v1019_v23, %v1015_v17  ;;  %1906 = vmatpush1.bf16.msra.mxu0 %v3043_v19  ;;  %975 = vmatprep.mubr.bf16.mxu1 %v3593_v5  ;;  %v3075_v19 = vld [vmem:[#allocation4 + $0x1b4] ss:$8 sps:$4 sm:$0xff]  }
 0x149   :  { %1907 = vmatprep.subr.bf16.mxu0 %v3048_v22 }
 0x14a   :  { %v674_v28 = vpop.f32.mrb[8].mxu1  ;;  %1752 = vmatprep.mubr.bf16.mxu0 %v1267_v25  ;;  %v3073_v25 = vld [vmem:[#allocation4 + $0x1b0] ss:$8 sps:$4 sm:$0xff]  }
 0x14b   :  { %v1022_v29 = vmax.f32 %v674_v28, 0.0  ;;  %v676_v30 = vpop.f32.mrb[9].mxu1  ;;  %1753 = vmatmul.mubr.bf16.gmra.mrb[4].mxu0 %v1266_v24  ;;  %v3078_v28 = vld [vmem:[#allocation4 + $0x1c4] ss:$8 sps:$4 sm:$0xff]  }
 0x14c   :  { %v1023_v31 = vmax.f32 %v676_v30, 0.0  ;;  %v678_v32 = vpop.f32.mrb[10].mxu1  ;;  %1908 = vmatpush1.bf16.msra.mxu0 %v3046_v26 }
 0x14d   :  { %1150 = vst [vmem:[%s4234_s3 + $0x80] sm:$0xff] %v1022_v29  ;;  %v1026_v35 = vmax.f32 %v678_v32, 0.0  ;;  %v680_v37 = vpop.f32.mrb[11].mxu1  ;;  %1909 = vmatprep.subr.bf16.mxu0 %v3051_v27  ;;  %v3076_v32 = vld [vmem:[#allocation4 + $0x1c0] ss:$8 sps:$4 sm:$0xff]  }
 0x14e   :  { %1151 = vst [vmem:[%s4234_s3 + $0x88] sm:$0xff] %v1023_v31  ;;  %v1027_v39 = vmax.f32 %v680_v37, 0.0 }
 0x14f   :  { %1154 = vst [vmem:[%s4234_s3 + $0xa0] sm:$0xff] %v1026_v35  ;;  %v1270_v42 = vpack.c.bf16 %v1026_v35, %v1022_v29  ;;  %976 = vmatmul.mubr.bf16.gmra.mrb[116].mxu1 %v3600_v9  ;;  %v3061_v9 = vld [vmem:[#allocation4 + $0x170] ss:$8 sps:$4 sm:$0xff]  }
 0x150   :  { %1155 = vst [vmem:[%s4234_s3 + $0xa8] sm:$0xff] %v1027_v39  ;;  %v1271_v43 = vpack.c.bf16 %v1027_v39, %v1023_v31  ;;  %985 = vmatprep.mubr.bf16.mxu1 %v3605_v10  ;;  %1910 = vmatpush1.bf16.msra.mxu0 %v3049_v33  ;;  %v3081_v33 = vld [vmem:[#allocation4 + $0x1d4] ss:$8 sps:$4 sm:$0xff]  }
 0x151   :  { %1911 = vmatprep.subr.bf16.mxu0 %v3054_v38 }
 0x152   :  { %v684_v48 = vpop.f32.mrb[12].mxu1  ;;  %1762 = vmatprep.mubr.bf16.mxu0 %v1271_v43  ;;  %v3079_v43 = vld [vmem:[#allocation4 + $0x1d0] ss:$8 sps:$4 sm:$0xff]  }
 0x153   :  { %v1030_v49 = vmax.f32 %v684_v48, 0.0  ;;  %v686_v50 = vpop.f32.mrb[13].mxu1  ;;  %1763 = vmatmul.mubr.bf16.gmra.mrb[8].mxu0 %v1270_v42  ;;  %v3084_v48 = vld [vmem:[#allocation4 + $0x1e4] ss:$8 sps:$4 sm:$0xff]  }
 0x154   :  { %v1031_v51 = vmax.f32 %v686_v50, 0.0  ;;  %v688_v54 = vpop.f32.mrb[14].mxu1  ;;  %1912 = vmatpush1.bf16.msra.mxu0 %v3052_v44 }
 0x155   :  { %1158 = vst [vmem:[%s4234_s3 + $0xc0] sm:$0xff] %v1030_v49  ;;  %v1034_v56 = vmax.f32 %v688_v54, 0.0  ;;  %v690_v57 = vpop.f32.mrb[15].mxu1  ;;  %1913 = vmatprep.subr.bf16.mxu0 %v3057_v45  ;;  %v3082_v54 = vld [vmem:[#allocation4 + $0x1e0] ss:$8 sps:$4 sm:$0xff]  }
 0x156   :  { %1159 = vst [vmem:[%s4234_s3 + $0xc8] sm:$0xff] %v1031_v51  ;;  %v1035_v59 = vmax.f32 %v690_v57, 0.0 }
 0x157   :  { %1162 = vst [vmem:[%s4234_s3 + $0xe0] sm:$0xff] %v1034_v56  ;;  %v1274_v62 = vpack.c.bf16 %v1034_v56, %v1030_v49  ;;  %986 = vmatmul.mubr.bf16.gmra.mrb[120].mxu1 %v3612_v11 }
 0x158   :  { %1163 = vst [vmem:[%s4234_s3 + $0xe8] sm:$0xff] %v1035_v59  ;;  %v1275_v63 = vpack.c.bf16 %v1035_v59, %v1031_v51  ;;  %995 = vmatprep.mubr.bf16.mxu1 %v3617_v12  ;;  %1914 = vmatpush1.bf16.msra.mxu0 %v3055_v55  ;;  %v3066_v12 = vld [vmem:[#allocation4 + $0x184] ss:$8 sps:$4 sm:$0xff]   ;;  %v3087_v55 = vld [vmem:[#allocation4 + $0x1f4] ss:$8 sps:$4 sm:$0xff]  }
 0x159   :  { %1915 = vmatprep.subr.bf16.mxu0 %v3060_v58 }
 0x15a   :  { %v694_v2 = vpop.f32.mrb[16].mxu1  ;;  %1772 = vmatprep.mubr.bf16.mxu0 %v1275_v63  ;;  %v3085_v63 = vld [vmem:[#allocation4 + $0x1f0] ss:$8 sps:$4 sm:$0xff]  }
 0x15b   :  { %v1038_v3 = vmax.f32 %v694_v2, 0.0  ;;  %v696_v4 = vpop.f32.mrb[17].mxu1  ;;  %1773 = vmatmul.mubr.bf16.gmra.mrb[12].mxu0 %v1274_v62 }
 0x15c   :  { %v1039_v5 = vmax.f32 %v696_v4, 0.0  ;;  %v698_v8 = vpop.f32.mrb[18].mxu1  ;;  %1916 = vmatpush1.bf16.msra.mxu0 %v3058_v0 }
 0x15d   :  { %1166 = vst [vmem:[%s4234_s3 + $0x100] sm:$0xff] %v1038_v3  ;;  %v1042_v10 = vmax.f32 %v698_v8, 0.0  ;;  %v700_v11 = vpop.f32.mrb[19].mxu1  ;;  %1917 = vmatprep.subr.bf16.mxu0 %v3063_v1 }
 0x15e   :  { %1167 = vst [vmem:[%s4234_s3 + $0x108] sm:$0xff] %v1039_v5  ;;  %v1043_v13 = vmax.f32 %v700_v11, 0.0 }
 0x15f   :  { %1170 = vst [vmem:[%s4234_s3 + $0x120] sm:$0xff] %v1042_v10  ;;  %v1278_v34 = vpack.c.bf16 %v1042_v10, %v1038_v3  ;;  %996 = vmatmul.mubr.bf16.gmra.mrb[124].mxu1 %v3624_v14 }
 0x160   :  { %1171 = vst [vmem:[%s4234_s3 + $0x128] sm:$0xff] %v1043_v13  ;;  %v1279_v36 = vpack.c.bf16 %v1043_v13, %v1039_v5  ;;  %1918 = vmatpush1.bf16.msra.mxu0 %v3061_v9 }
 0x161   :  { %1919 = vmatprep.subr.bf16.mxu0 %v3066_v12 }
 0x162   :  { %v704_v46 = vpop.f32.mrb[20].mxu1  ;;  %1782 = vmatprep.mubr.bf16.mxu0 %v1279_v36 }
 0x163   :  { %v1046_v47 = vmax.f32 %v704_v46, 0.0  ;;  %v706_v52 = vpop.f32.mrb[21].mxu1  ;;  %1783 = vmatmul.mubr.bf16.gmra.mrb[16].mxu0 %v1278_v34 }
 0x164   :  { %v1047_v53 = vmax.f32 %v706_v52, 0.0  ;;  %v708_v60 = vpop.f32.mrb[22].mxu1  ;;  %1920 = vmatpush1.bf16.msra.mxu0 %v3064_v40 }
 0x165   :  { %1174 = vst [vmem:[%s4234_s3 + $0x140] sm:$0xff] %v1046_v47  ;;  %v1050_v14 = vmax.f32 %v708_v60, 0.0  ;;  %v710_v6 = vpop.f32.mrb[23].mxu1  ;;  %1921 = vmatprep.subr.bf16.mxu0 %v3069_v41 }
 0x166   :  { %1175 = vst [vmem:[%s4234_s3 + $0x148] sm:$0xff] %v1047_v53  ;;  %v1051_v15 = vmax.f32 %v710_v6, 0.0 }
 0x167   :  { %1178 = vst [vmem:[%s4234_s3 + $0x160] sm:$0xff] %v1050_v14  ;;  %v1282_v16 = vpack.c.bf16 %v1050_v14, %v1046_v47 }
 0x168   :  { %1179 = vst [vmem:[%s4234_s3 + $0x168] sm:$0xff] %v1051_v15  ;;  %v1283_v17 = vpack.c.bf16 %v1051_v15, %v1047_v53  ;;  %1922 = vmatpush1.bf16.msra.mxu0 %v3067_v61 }
 0x169   :  { %1923 = vmatprep.subr.bf16.mxu0 %v3072_v7 }
 0x16a   :  { %v714_v20 = vpop.f32.mrb[24].mxu1  ;;  %1792 = vmatprep.mubr.bf16.mxu0 %v1283_v17 }
 0x16b   :  { %v1054_v21 = vmax.f32 %v714_v20, 0.0  ;;  %v716_v22 = vpop.f32.mrb[25].mxu1  ;;  %1793 = vmatmul.mubr.bf16.gmra.mrb[20].mxu0 %v1282_v16 }
 0x16c   :  { %v1055_v23 = vmax.f32 %v716_v22, 0.0  ;;  %v718_v24 = vpop.f32.mrb[26].mxu1  ;;  %1924 = vmatpush1.bf16.msra.mxu0 %v3070_v18 }
 0x16d   :  { %1182 = vst [vmem:[%s4234_s3 + $0x180] sm:$0xff] %v1054_v21  ;;  %v1058_v26 = vmax.f32 %v718_v24, 0.0  ;;  %v720_v27 = vpop.f32.mrb[27].mxu1  ;;  %1925 = vmatprep.subr.bf16.mxu0 %v3075_v19 }
 0x16e   :  { %1183 = vst [vmem:[%s4234_s3 + $0x188] sm:$0xff] %v1055_v23  ;;  %v1059_v29 = vmax.f32 %v720_v27, 0.0 }
 0x16f   :  { %1186 = vst [vmem:[%s4234_s3 + $0x1a0] sm:$0xff] %v1058_v26  ;;  %v1286_v30 = vpack.c.bf16 %v1058_v26, %v1054_v21 }
 0x170   :  { %1187 = vst [vmem:[%s4234_s3 + $0x1a8] sm:$0xff] %v1059_v29  ;;  %v1287_v31 = vpack.c.bf16 %v1059_v29, %v1055_v23  ;;  %1926 = vmatpush1.bf16.msra.mxu0 %v3073_v25 }
 0x171   :  { %1927 = vmatprep.subr.bf16.mxu0 %v3078_v28 }
 0x172   :  { %v724_v35 = vpop.f32.mrb[28].mxu1  ;;  %1802 = vmatprep.mubr.bf16.mxu0 %v1287_v31 }
 0x173   :  { %v1062_v37 = vmax.f32 %v724_v35, 0.0  ;;  %v726_v38 = vpop.f32.mrb[29].mxu1  ;;  %1803 = vmatmul.mubr.bf16.gmra.mrb[24].mxu0 %v1286_v30 }
 0x174   :  { %v1063_v39 = vmax.f32 %v726_v38, 0.0  ;;  %v728_v42 = vpop.f32.mrb[30].mxu1  ;;  %1928 = vmatpush1.bf16.msra.mxu0 %v3076_v32 }
 0x175   :  { %1190 = vst [vmem:[%s4234_s3 + $0x1c0] sm:$0xff] %v1062_v37  ;;  %v1066_v44 = vmax.f32 %v728_v42, 0.0  ;;  %v730_v45 = vpop.f32.mrb[31].mxu1  ;;  %1929 = vmatprep.subr.bf16.mxu0 %v3081_v33 }
 0x176   :  { %1191 = vst [vmem:[%s4234_s3 + $0x1c8] sm:$0xff] %v1063_v39  ;;  %v1067_v49 = vmax.f32 %v730_v45, 0.0 }
 0x177   :  { %1194 = vst [vmem:[%s4234_s3 + $0x1e0] sm:$0xff] %v1066_v44  ;;  %v1290_v50 = vpack.c.bf16 %v1066_v44, %v1062_v37 }
 0x178   :  { %1195 = vst [vmem:[%s4234_s3 + $0x1e8] sm:$0xff] %v1067_v49  ;;  %v1291_v51 = vpack.c.bf16 %v1067_v49, %v1063_v39  ;;  %1930 = vmatpush1.bf16.msra.mxu0 %v3079_v43 }
 0x179   :  { %1931 = vmatprep.subr.bf16.mxu0 %v3084_v48 }
 0x17a   :  { %v734_v56 = vpop.f32.mrb[32].mxu1  ;;  %1812 = vmatprep.mubr.bf16.mxu0 %v1291_v51 }
 0x17b   :  { %v1070_v57 = vmax.f32 %v734_v56, 0.0  ;;  %v736_v58 = vpop.f32.mrb[33].mxu1  ;;  %1813 = vmatmul.mubr.bf16.gmra.mrb[28].mxu0 %v1290_v50 }
 0x17c   :  { %v1071_v59 = vmax.f32 %v736_v58, 0.0  ;;  %v738_v62 = vpop.f32.mrb[34].mxu1  ;;  %1932 = vmatpush1.bf16.msra.mxu0 %v3082_v54 }
 0x17d   :  { %1198 = vst [vmem:[%s4234_s3 + $0x200] sm:$0xff] %v1070_v57  ;;  %v1074_v0 = vmax.f32 %v738_v62, 0.0  ;;  %v740_v1 = vpop.f32.mrb[35].mxu1  ;;  %1933 = vmatprep.subr.bf16.mxu0 %v3087_v55 }
 0x17e   :  { %1199 = vst [vmem:[%s4234_s3 + $0x208] sm:$0xff] %v1071_v59  ;;  %v1075_v2 = vmax.f32 %v740_v1, 0.0 }
 0x17f   :  { %1202 = vst [vmem:[%s4234_s3 + $0x220] sm:$0xff] %v1074_v0  ;;  %v1294_v3 = vpack.c.bf16 %v1074_v0, %v1070_v57 }
 0x180   :  { %1203 = vst [vmem:[%s4234_s3 + $0x228] sm:$0xff] %v1075_v2  ;;  %v1295_v4 = vpack.c.bf16 %v1075_v2, %v1071_v59  ;;  %1934 = vmatpush1.bf16.msra.mxu0 %v3085_v63 }
 0x182   :  { %v744_v5 = vpop.f32.mrb[36].mxu1  ;;  %1822 = vmatprep.mubr.bf16.mxu0 %v1295_v4 }
 0x183   :  { %v1078_v8 = vmax.f32 %v744_v5, 0.0  ;;  %v746_v9 = vpop.f32.mrb[37].mxu1  ;;  %1823 = vmatmul.mubr.bf16.gmra.mrb[32].mxu0 %v1294_v3 }
 0x184   :  { %v1079_v10 = vmax.f32 %v746_v9, 0.0  ;;  %v748_v11 = vpop.f32.mrb[38].mxu1 }
 0x185   :  { %1206 = vst [vmem:[%s4234_s3 + $0x240] sm:$0xff] %v1078_v8  ;;  %v1082_v12 = vmax.f32 %v748_v11, 0.0  ;;  %v750_v13 = vpop.f32.mrb[39].mxu1 }
 0x186   :  { %1207 = vst [vmem:[%s4234_s3 + $0x248] sm:$0xff] %v1079_v10  ;;  %v1083_v34 = vmax.f32 %v750_v13, 0.0 }
 0x187   :  { %1210 = vst [vmem:[%s4234_s3 + $0x260] sm:$0xff] %v1082_v12  ;;  %v1298_v36 = vpack.c.bf16 %v1082_v12, %v1078_v8 }
 0x188   :  { %1211 = vst [vmem:[%s4234_s3 + $0x268] sm:$0xff] %v1083_v34  ;;  %v1299_v40 = vpack.c.bf16 %v1083_v34, %v1079_v10 }
 0x18a   :  { %v754_v41 = vpop.f32.mrb[40].mxu1  ;;  %1832 = vmatprep.mubr.bf16.mxu0 %v1299_v40 }
 0x18b   :  { %v1086_v46 = vmax.f32 %v754_v41, 0.0  ;;  %v756_v47 = vpop.f32.mrb[41].mxu1  ;;  %1833 = vmatmul.mubr.bf16.gmra.mrb[36].mxu0 %v1298_v36 }
 0x18c   :  { %v1087_v52 = vmax.f32 %v756_v47, 0.0  ;;  %v758_v53 = vpop.f32.mrb[42].mxu1 }
 0x18d   :  { %1214 = vst [vmem:[%s4234_s3 + $0x280] sm:$0xff] %v1086_v46  ;;  %v1090_v60 = vmax.f32 %v758_v53, 0.0  ;;  %v760_v61 = vpop.f32.mrb[43].mxu1 }
 0x18e   :  { %1215 = vst [vmem:[%s4234_s3 + $0x288] sm:$0xff] %v1087_v52  ;;  %v1091_v14 = vmax.f32 %v760_v61, 0.0 }
 0x18f   :  { %1218 = vst [vmem:[%s4234_s3 + $0x2a0] sm:$0xff] %v1090_v60  ;;  %v1302_v6 = vpack.c.bf16 %v1090_v60, %v1086_v46 }
 0x190   :  { %1219 = vst [vmem:[%s4234_s3 + $0x2a8] sm:$0xff] %v1091_v14  ;;  %v1303_v7 = vpack.c.bf16 %v1091_v14, %v1087_v52 }
 0x192   :  { %v764_v15 = vpop.f32.mrb[44].mxu1  ;;  %1842 = vmatprep.mubr.bf16.mxu0 %v1303_v7 }
 0x193   :  { %v1094_v16 = vmax.f32 %v764_v15, 0.0  ;;  %v766_v17 = vpop.f32.mrb[45].mxu1  ;;  %1843 = vmatmul.mubr.bf16.gmra.mrb[40].mxu0 %v1302_v6 }
 0x194   :  { %v1095_v18 = vmax.f32 %v766_v17, 0.0  ;;  %v768_v19 = vpop.f32.mrb[46].mxu1 }
 0x195   :  { %1222 = vst [vmem:[%s4234_s3 + $0x2c0] sm:$0xff] %v1094_v16  ;;  %v1098_v20 = vmax.f32 %v768_v19, 0.0  ;;  %v770_v21 = vpop.f32.mrb[47].mxu1 }
 0x196   :  { %1223 = vst [vmem:[%s4234_s3 + $0x2c8] sm:$0xff] %v1095_v18  ;;  %v1099_v22 = vmax.f32 %v770_v21, 0.0 }
 0x197   :  { %1226 = vst [vmem:[%s4234_s3 + $0x2e0] sm:$0xff] %v1098_v20  ;;  %v1306_v23 = vpack.c.bf16 %v1098_v20, %v1094_v16 }
 0x198   :  { %1227 = vst [vmem:[%s4234_s3 + $0x2e8] sm:$0xff] %v1099_v22  ;;  %v1307_v24 = vpack.c.bf16 %v1099_v22, %v1095_v18 }
 0x19a   :  { %v774_v25 = vpop.f32.mrb[48].mxu1  ;;  %1852 = vmatprep.mubr.bf16.mxu0 %v1307_v24 }
 0x19b   :  { %v1102_v26 = vmax.f32 %v774_v25, 0.0  ;;  %v776_v27 = vpop.f32.mrb[49].mxu1  ;;  %1853 = vmatmul.mubr.bf16.gmra.mrb[44].mxu0 %v1306_v23 }
 0x19c   :  { %v1103_v28 = vmax.f32 %v776_v27, 0.0  ;;  %v778_v29 = vpop.f32.mrb[50].mxu1 }
 0x19d   :  { %1230 = vst [vmem:[%s4234_s3 + $0x300] sm:$0xff] %v1102_v26  ;;  %v1106_v30 = vmax.f32 %v778_v29, 0.0  ;;  %v780_v31 = vpop.f32.mrb[51].mxu1 }
 0x19e   :  { %1231 = vst [vmem:[%s4234_s3 + $0x308] sm:$0xff] %v1103_v28  ;;  %v1107_v32 = vmax.f32 %v780_v31, 0.0 }
 0x19f   :  { %1234 = vst [vmem:[%s4234_s3 + $0x320] sm:$0xff] %v1106_v30  ;;  %v1310_v33 = vpack.c.bf16 %v1106_v30, %v1102_v26 }
 0x1a0   :  { %1235 = vst [vmem:[%s4234_s3 + $0x328] sm:$0xff] %v1107_v32  ;;  %v1311_v35 = vpack.c.bf16 %v1107_v32, %v1103_v28 }
 0x1a2   :  { %v784_v37 = vpop.f32.mrb[52].mxu1  ;;  %1862 = vmatprep.mubr.bf16.mxu0 %v1311_v35 }
 0x1a3   :  { %v1110_v38 = vmax.f32 %v784_v37, 0.0  ;;  %v786_v39 = vpop.f32.mrb[53].mxu1  ;;  %1863 = vmatmul.mubr.bf16.gmra.mrb[48].mxu0 %v1310_v33 }
 0x1a4   :  { %v1111_v42 = vmax.f32 %v786_v39, 0.0  ;;  %v788_v43 = vpop.f32.mrb[54].mxu1 }
 0x1a5   :  { %1238 = vst [vmem:[%s4234_s3 + $0x340] sm:$0xff] %v1110_v38  ;;  %v1114_v44 = vmax.f32 %v788_v43, 0.0  ;;  %v790_v45 = vpop.f32.mrb[55].mxu1 }
 0x1a6   :  { %1239 = vst [vmem:[%s4234_s3 + $0x348] sm:$0xff] %v1111_v42  ;;  %v1115_v48 = vmax.f32 %v790_v45, 0.0 }
 0x1a7   :  { %1242 = vst [vmem:[%s4234_s3 + $0x360] sm:$0xff] %v1114_v44  ;;  %v1314_v49 = vpack.c.bf16 %v1114_v44, %v1110_v38 }
 0x1a8   :  { %1243 = vst [vmem:[%s4234_s3 + $0x368] sm:$0xff] %v1115_v48  ;;  %v1315_v50 = vpack.c.bf16 %v1115_v48, %v1111_v42 }
 0x1aa   :  { %v794_v51 = vpop.f32.mrb[56].mxu1  ;;  %1872 = vmatprep.mubr.bf16.mxu0 %v1315_v50 }
 0x1ab   :  { %v1118_v54 = vmax.f32 %v794_v51, 0.0  ;;  %v796_v55 = vpop.f32.mrb[57].mxu1  ;;  %1873 = vmatmul.mubr.bf16.gmra.mrb[52].mxu0 %v1314_v49 }
 0x1ac   :  { %v1119_v56 = vmax.f32 %v796_v55, 0.0  ;;  %v798_v57 = vpop.f32.mrb[58].mxu1 }
 0x1ad   :  { %1246 = vst [vmem:[%s4234_s3 + $0x380] sm:$0xff] %v1118_v54  ;;  %v1122_v58 = vmax.f32 %v798_v57, 0.0  ;;  %v800_v59 = vpop.f32.mrb[59].mxu1 }
 0x1ae   :  { %1247 = vst [vmem:[%s4234_s3 + $0x388] sm:$0xff] %v1119_v56  ;;  %v1123_v62 = vmax.f32 %v800_v59, 0.0 }
 0x1af   :  { %1250 = vst [vmem:[%s4234_s3 + $0x3a0] sm:$0xff] %v1122_v58  ;;  %v1318_v63 = vpack.c.bf16 %v1122_v58, %v1118_v54 }
 0x1b0   :  { %1251 = vst [vmem:[%s4234_s3 + $0x3a8] sm:$0xff] %v1123_v62  ;;  %v1319_v0 = vpack.c.bf16 %v1123_v62, %v1119_v56 }
 0x1b2   :  { %v804_v1 = vpop.f32.mrb[60].mxu1  ;;  %1882 = vmatprep.mubr.bf16.mxu0 %v1319_v0 }
 0x1b3   :  { %v1126_v2 = vmax.f32 %v804_v1, 0.0  ;;  %v806_v3 = vpop.f32.mrb[61].mxu1  ;;  %1883 = vmatmul.mubr.bf16.gmra.mrb[56].mxu0 %v1318_v63 }
 0x1b4   :  { %v1127_v4 = vmax.f32 %v806_v3, 0.0  ;;  %v808_v5 = vpop.f32.mrb[62].mxu1 }
 0x1b5   :  { %1254 = vst [vmem:[%s4234_s3 + $0x3c0] sm:$0xff] %v1126_v2  ;;  %v1130_v8 = vmax.f32 %v808_v5, 0.0  ;;  %v810_v9 = vpop.f32.mrb[63].mxu1 }
 0x1b6   :  { %1255 = vst [vmem:[%s4234_s3 + $0x3c8] sm:$0xff] %v1127_v4  ;;  %v1131_v10 = vmax.f32 %v810_v9, 0.0 }
 0x1b7   :  { %1258 = vst [vmem:[%s4234_s3 + $0x3e0] sm:$0xff] %v1130_v8  ;;  %v1322_v11 = vpack.c.bf16 %v1130_v8, %v1126_v2 }
 0x1b8   :  { %1259 = vst [vmem:[%s4234_s3 + $0x3e8] sm:$0xff] %v1131_v10  ;;  %v1323_v12 = vpack.c.bf16 %v1131_v10, %v1127_v4 }
 0x1ba   :  { %v847_v13 = vpop.f32.mrb[64].mxu1  ;;  %1892 = vmatprep.mubr.bf16.mxu0 %v1323_v12 }
 0x1bb   :  { %v1008_v34 = vmax.f32 %v847_v13, 0.0  ;;  %v849_v36 = vpop.f32.mrb[65].mxu1  ;;  %1893 = vmatmul.mubr.bf16.gmra.mrb[60].mxu0 %v1322_v11 }
 0x1bc   :  { %v1009_v40 = vmax.f32 %v849_v36, 0.0  ;;  %v851_v41 = vpop.f32.mrb[66].mxu1 }
 0x1bd   :  { %1136 = vst [vmem:[%s4234_s3 + $0x10] sm:$0xff] %v1008_v34  ;;  %v1012_v46 = vmax.f32 %v851_v41, 0.0  ;;  %v853_v47 = vpop.f32.mrb[67].mxu1 }
 0x1be   :  { %1137 = vst [vmem:[%s4234_s3 + $0x18] sm:$0xff] %v1009_v40  ;;  %v1013_v52 = vmax.f32 %v853_v47, 0.0 }
 0x1bf   :  { %1140 = vst [vmem:[%s4234_s3 + $0x30] sm:$0xff] %v1012_v46  ;;  %v1264_v53 = vpack.c.bf16 %v1012_v46, %v1008_v34 }
 0x1c0   :  { %1141 = vst [vmem:[%s4234_s3 + $0x38] sm:$0xff] %v1013_v52  ;;  %v1265_v60 = vpack.c.bf16 %v1013_v52, %v1009_v40 }
 0x1c2   :  { %v857_v61 = vpop.f32.mrb[68].mxu1  ;;  %1935 = vmatprep.mubr.bf16.mxu0 %v1265_v60 }
 0x1c3   :  { %v1016_v14 = vmax.f32 %v857_v61, 0.0  ;;  %v859_v6 = vpop.f32.mrb[69].mxu1  ;;  %1936 = vmatmul.mubr.bf16.vlgmr.msra.gmra.mrb[0].mxu0 %v1264_v53 }
 0x1c4   :  { %v1017_v7 = vmax.f32 %v859_v6, 0.0  ;;  %v861_v15 = vpop.f32.mrb[70].mxu1 }
 0x1c5   :  { %1144 = vst [vmem:[%s4234_s3 + $0x50] sm:$0xff] %v1016_v14  ;;  %v1020_v16 = vmax.f32 %v861_v15, 0.0  ;;  %v863_v17 = vpop.f32.mrb[71].mxu1 }
 0x1c6   :  { %1145 = vst [vmem:[%s4234_s3 + $0x58] sm:$0xff] %v1017_v7  ;;  %v1021_v18 = vmax.f32 %v863_v17, 0.0 }
 0x1c7   :  { %1148 = vst [vmem:[%s4234_s3 + $0x70] sm:$0xff] %v1020_v16  ;;  %v1268_v19 = vpack.c.bf16 %v1020_v16, %v1016_v14 }
 0x1c8   :  { %1149 = vst [vmem:[%s4234_s3 + $0x78] sm:$0xff] %v1021_v18  ;;  %v1269_v20 = vpack.c.bf16 %v1021_v18, %v1017_v7 }
 0x1ca   :  { %v867_v21 = vpop.f32.mrb[72].mxu1  ;;  %1945 = vmatprep.mubr.bf16.mxu0 %v1269_v20 }
 0x1cb   :  { %v1024_v22 = vmax.f32 %v867_v21, 0.0  ;;  %v869_v23 = vpop.f32.mrb[73].mxu1  ;;  %1946 = vmatmul.mubr.bf16.gmra.mrb[4].mxu0 %v1268_v19 }
 0x1cc   :  { %v1025_v24 = vmax.f32 %v869_v23, 0.0  ;;  %v871_v25 = vpop.f32.mrb[74].mxu1 }
 0x1cd   :  { %1152 = vst [vmem:[%s4234_s3 + $0x90] sm:$0xff] %v1024_v22  ;;  %v1028_v26 = vmax.f32 %v871_v25, 0.0  ;;  %v873_v27 = vpop.f32.mrb[75].mxu1 }
 0x1ce   :  { %1153 = vst [vmem:[%s4234_s3 + $0x98] sm:$0xff] %v1025_v24  ;;  %v1029_v28 = vmax.f32 %v873_v27, 0.0 }
 0x1cf   :  { %1156 = vst [vmem:[%s4234_s3 + $0xb0] sm:$0xff] %v1028_v26  ;;  %v1272_v29 = vpack.c.bf16 %v1028_v26, %v1024_v22 }
 0x1d0   :  { %1157 = vst [vmem:[%s4234_s3 + $0xb8] sm:$0xff] %v1029_v28  ;;  %v1273_v30 = vpack.c.bf16 %v1029_v28, %v1025_v24 }
 0x1d2   :  { %v877_v31 = vpop.f32.mrb[76].mxu1  ;;  %1955 = vmatprep.mubr.bf16.mxu0 %v1273_v30 }
 0x1d3   :  { %v1032_v32 = vmax.f32 %v877_v31, 0.0  ;;  %v879_v33 = vpop.f32.mrb[77].mxu1  ;;  %1956 = vmatmul.mubr.bf16.gmra.mrb[8].mxu0 %v1272_v29 }
 0x1d4   :  { %v1033_v35 = vmax.f32 %v879_v33, 0.0  ;;  %v881_v37 = vpop.f32.mrb[78].mxu1 }
 0x1d5   :  { %1160 = vst [vmem:[%s4234_s3 + $0xd0] sm:$0xff] %v1032_v32  ;;  %v1036_v38 = vmax.f32 %v881_v37, 0.0  ;;  %v883_v39 = vpop.f32.mrb[79].mxu1 }
 0x1d6   :  { %1161 = vst [vmem:[%s4234_s3 + $0xd8] sm:$0xff] %v1033_v35  ;;  %v1037_v42 = vmax.f32 %v883_v39, 0.0 }
 0x1d7   :  { %1164 = vst [vmem:[%s4234_s3 + $0xf0] sm:$0xff] %v1036_v38  ;;  %v1276_v43 = vpack.c.bf16 %v1036_v38, %v1032_v32 }
 0x1d8   :  { %1165 = vst [vmem:[%s4234_s3 + $0xf8] sm:$0xff] %v1037_v42  ;;  %v1277_v44 = vpack.c.bf16 %v1037_v42, %v1033_v35 }
 0x1da   :  { %v887_v45 = vpop.f32.mrb[80].mxu1  ;;  %1965 = vmatprep.mubr.bf16.mxu0 %v1277_v44 }
 0x1db   :  { %v1040_v48 = vmax.f32 %v887_v45, 0.0  ;;  %v889_v49 = vpop.f32.mrb[81].mxu1  ;;  %1966 = vmatmul.mubr.bf16.gmra.mrb[12].mxu0 %v1276_v43 }
 0x1dc   :  { %v1041_v50 = vmax.f32 %v889_v49, 0.0  ;;  %v891_v51 = vpop.f32.mrb[82].mxu1 }
 0x1dd   :  { %1168 = vst [vmem:[%s4234_s3 + $0x110] sm:$0xff] %v1040_v48  ;;  %v1044_v54 = vmax.f32 %v891_v51, 0.0  ;;  %v893_v55 = vpop.f32.mrb[83].mxu1 }
 0x1de   :  { %1169 = vst [vmem:[%s4234_s3 + $0x118] sm:$0xff] %v1041_v50  ;;  %v1045_v56 = vmax.f32 %v893_v55, 0.0 }
 0x1df   :  { %1172 = vst [vmem:[%s4234_s3 + $0x130] sm:$0xff] %v1044_v54  ;;  %v1280_v57 = vpack.c.bf16 %v1044_v54, %v1040_v48 }
 0x1e0   :  { %1173 = vst [vmem:[%s4234_s3 + $0x138] sm:$0xff] %v1045_v56  ;;  %v1281_v58 = vpack.c.bf16 %v1045_v56, %v1041_v50 }
 0x1e2   :  { %v897_v59 = vpop.f32.mrb[84].mxu1  ;;  %1975 = vmatprep.mubr.bf16.mxu0 %v1281_v58 }
 0x1e3   :  { %v1048_v62 = vmax.f32 %v897_v59, 0.0  ;;  %v899_v63 = vpop.f32.mrb[85].mxu1  ;;  %1976 = vmatmul.mubr.bf16.gmra.mrb[16].mxu0 %v1280_v57 }
 0x1e4   :  { %v1049_v0 = vmax.f32 %v899_v63, 0.0  ;;  %v901_v1 = vpop.f32.mrb[86].mxu1 }
 0x1e5   :  { %1176 = vst [vmem:[%s4234_s3 + $0x150] sm:$0xff] %v1048_v62  ;;  %v1052_v2 = vmax.f32 %v901_v1, 0.0  ;;  %v903_v3 = vpop.f32.mrb[87].mxu1 }
 0x1e6   :  { %1177 = vst [vmem:[%s4234_s3 + $0x158] sm:$0xff] %v1049_v0  ;;  %v1053_v4 = vmax.f32 %v903_v3, 0.0 }
 0x1e7   :  { %1180 = vst [vmem:[%s4234_s3 + $0x170] sm:$0xff] %v1052_v2  ;;  %v1284_v5 = vpack.c.bf16 %v1052_v2, %v1048_v62 }
 0x1e8   :  { %1181 = vst [vmem:[%s4234_s3 + $0x178] sm:$0xff] %v1053_v4  ;;  %v1285_v8 = vpack.c.bf16 %v1053_v4, %v1049_v0 }
 0x1ea   :  { %v907_v9 = vpop.f32.mrb[88].mxu1  ;;  %1985 = vmatprep.mubr.bf16.mxu0 %v1285_v8 }
 0x1eb   :  { %v1056_v10 = vmax.f32 %v907_v9, 0.0  ;;  %v909_v11 = vpop.f32.mrb[89].mxu1  ;;  %1986 = vmatmul.mubr.bf16.gmra.mrb[20].mxu0 %v1284_v5 }
 0x1ec   :  { %v1057_v12 = vmax.f32 %v909_v11, 0.0  ;;  %v911_v13 = vpop.f32.mrb[90].mxu1 }
 0x1ed   :  { %1184 = vst [vmem:[%s4234_s3 + $0x190] sm:$0xff] %v1056_v10  ;;  %v1060_v34 = vmax.f32 %v911_v13, 0.0  ;;  %v913_v36 = vpop.f32.mrb[91].mxu1 }
 0x1ee   :  { %1185 = vst [vmem:[%s4234_s3 + $0x198] sm:$0xff] %v1057_v12  ;;  %v1061_v40 = vmax.f32 %v913_v36, 0.0 }
 0x1ef   :  { %1188 = vst [vmem:[%s4234_s3 + $0x1b0] sm:$0xff] %v1060_v34  ;;  %v1288_v41 = vpack.c.bf16 %v1060_v34, %v1056_v10 }
 0x1f0   :  { %1189 = vst [vmem:[%s4234_s3 + $0x1b8] sm:$0xff] %v1061_v40  ;;  %v1289_v46 = vpack.c.bf16 %v1061_v40, %v1057_v12 }
 0x1f2   :  { %v917_v47 = vpop.f32.mrb[92].mxu1  ;;  %1995 = vmatprep.mubr.bf16.mxu0 %v1289_v46 }
 0x1f3   :  { %v1064_v52 = vmax.f32 %v917_v47, 0.0  ;;  %v919_v53 = vpop.f32.mrb[93].mxu1  ;;  %1996 = vmatmul.mubr.bf16.gmra.mrb[24].mxu0 %v1288_v41 }
 0x1f4   :  { %v1065_v60 = vmax.f32 %v919_v53, 0.0  ;;  %v921_v61 = vpop.f32.mrb[94].mxu1 }
 0x1f5   :  { %1192 = vst [vmem:[%s4234_s3 + $0x1d0] sm:$0xff] %v1064_v52  ;;  %v1068_v14 = vmax.f32 %v921_v61, 0.0  ;;  %v923_v6 = vpop.f32.mrb[95].mxu1 }
 0x1f6   :  { %1193 = vst [vmem:[%s4234_s3 + $0x1d8] sm:$0xff] %v1065_v60  ;;  %v1069_v7 = vmax.f32 %v923_v6, 0.0 }
 0x1f7   :  { %1196 = vst [vmem:[%s4234_s3 + $0x1f0] sm:$0xff] %v1068_v14  ;;  %v1292_v15 = vpack.c.bf16 %v1068_v14, %v1064_v52 }
 0x1f8   :  { %1197 = vst [vmem:[%s4234_s3 + $0x1f8] sm:$0xff] %v1069_v7  ;;  %v1293_v16 = vpack.c.bf16 %v1069_v7, %v1065_v60 }
 0x1fa   :  { %v927_v17 = vpop.f32.mrb[96].mxu1  ;;  %2005 = vmatprep.mubr.bf16.mxu0 %v1293_v16 }
 0x1fb   :  { %v1072_v18 = vmax.f32 %v927_v17, 0.0  ;;  %v929_v19 = vpop.f32.mrb[97].mxu1  ;;  %2006 = vmatmul.mubr.bf16.gmra.mrb[28].mxu0 %v1292_v15 }
 0x1fc   :  { %v1073_v20 = vmax.f32 %v929_v19, 0.0  ;;  %v931_v21 = vpop.f32.mrb[98].mxu1 }
 0x1fd   :  { %1200 = vst [vmem:[%s4234_s3 + $0x210] sm:$0xff] %v1072_v18  ;;  %v1076_v22 = vmax.f32 %v931_v21, 0.0  ;;  %v933_v23 = vpop.f32.mrb[99].mxu1 }
 0x1fe   :  { %1201 = vst [vmem:[%s4234_s3 + $0x218] sm:$0xff] %v1073_v20  ;;  %v1077_v24 = vmax.f32 %v933_v23, 0.0 }
 0x1ff   :  { %1204 = vst [vmem:[%s4234_s3 + $0x230] sm:$0xff] %v1076_v22  ;;  %v1296_v25 = vpack.c.bf16 %v1076_v22, %v1072_v18 }
 0x200   :  { %1205 = vst [vmem:[%s4234_s3 + $0x238] sm:$0xff] %v1077_v24  ;;  %v1297_v26 = vpack.c.bf16 %v1077_v24, %v1073_v20 }
 0x202   :  { %v937_v27 = vpop.f32.mrb[100].mxu1  ;;  %2015 = vmatprep.mubr.bf16.mxu0 %v1297_v26 }
 0x203   :  { %v1080_v28 = vmax.f32 %v937_v27, 0.0  ;;  %v939_v29 = vpop.f32.mrb[101].mxu1  ;;  %2016 = vmatmul.mubr.bf16.gmra.mrb[32].mxu0 %v1296_v25 }
 0x204   :  { %v1081_v30 = vmax.f32 %v939_v29, 0.0  ;;  %v941_v31 = vpop.f32.mrb[102].mxu1 }
 0x205   :  { %1208 = vst [vmem:[%s4234_s3 + $0x250] sm:$0xff] %v1080_v28  ;;  %v1084_v32 = vmax.f32 %v941_v31, 0.0  ;;  %v943_v33 = vpop.f32.mrb[103].mxu1 }
 0x206   :  { %1209 = vst [vmem:[%s4234_s3 + $0x258] sm:$0xff] %v1081_v30  ;;  %v1085_v35 = vmax.f32 %v943_v33, 0.0 }
 0x207   :  { %1212 = vst [vmem:[%s4234_s3 + $0x270] sm:$0xff] %v1084_v32  ;;  %v1300_v37 = vpack.c.bf16 %v1084_v32, %v1080_v28 }
 0x208   :  { %1213 = vst [vmem:[%s4234_s3 + $0x278] sm:$0xff] %v1085_v35  ;;  %v1301_v38 = vpack.c.bf16 %v1085_v35, %v1081_v30 }
 0x20a   :  { %v947_v39 = vpop.f32.mrb[104].mxu1  ;;  %2025 = vmatprep.mubr.bf16.mxu0 %v1301_v38 }
 0x20b   :  { %v1088_v42 = vmax.f32 %v947_v39, 0.0  ;;  %v949_v43 = vpop.f32.mrb[105].mxu1  ;;  %2026 = vmatmul.mubr.bf16.gmra.mrb[36].mxu0 %v1300_v37 }
 0x20c   :  { %v1089_v44 = vmax.f32 %v949_v43, 0.0  ;;  %v951_v45 = vpop.f32.mrb[106].mxu1 }
 0x20d   :  { %1216 = vst [vmem:[%s4234_s3 + $0x290] sm:$0xff] %v1088_v42  ;;  %v1092_v48 = vmax.f32 %v951_v45, 0.0  ;;  %v953_v49 = vpop.f32.mrb[107].mxu1 }
 0x20e   :  { %1217 = vst [vmem:[%s4234_s3 + $0x298] sm:$0xff] %v1089_v44  ;;  %v1093_v50 = vmax.f32 %v953_v49, 0.0 }
 0x20f   :  { %1220 = vst [vmem:[%s4234_s3 + $0x2b0] sm:$0xff] %v1092_v48  ;;  %v1304_v51 = vpack.c.bf16 %v1092_v48, %v1088_v42 }
 0x210   :  { %1221 = vst [vmem:[%s4234_s3 + $0x2b8] sm:$0xff] %v1093_v50  ;;  %v1305_v54 = vpack.c.bf16 %v1093_v50, %v1089_v44 }
 0x212   :  { %v957_v55 = vpop.f32.mrb[108].mxu1  ;;  %2035 = vmatprep.mubr.bf16.mxu0 %v1305_v54 }
 0x213   :  { %v1096_v56 = vmax.f32 %v957_v55, 0.0  ;;  %v959_v57 = vpop.f32.mrb[109].mxu1  ;;  %2036 = vmatmul.mubr.bf16.gmra.mrb[40].mxu0 %v1304_v51 }
 0x214   :  { %v1097_v58 = vmax.f32 %v959_v57, 0.0  ;;  %v961_v59 = vpop.f32.mrb[110].mxu1 }
 0x215   :  { %1224 = vst [vmem:[%s4234_s3 + $0x2d0] sm:$0xff] %v1096_v56  ;;  %v1100_v62 = vmax.f32 %v961_v59, 0.0  ;;  %v963_v63 = vpop.f32.mrb[111].mxu1 }
 0x216   :  { %1225 = vst [vmem:[%s4234_s3 + $0x2d8] sm:$0xff] %v1097_v58  ;;  %v1101_v0 = vmax.f32 %v963_v63, 0.0 }
 0x217   :  { %1228 = vst [vmem:[%s4234_s3 + $0x2f0] sm:$0xff] %v1100_v62  ;;  %v1308_v1 = vpack.c.bf16 %v1100_v62, %v1096_v56 }
 0x218   :  { %1229 = vst [vmem:[%s4234_s3 + $0x2f8] sm:$0xff] %v1101_v0  ;;  %v1309_v2 = vpack.c.bf16 %v1101_v0, %v1097_v58 }
 0x21a   :  { %v967_v3 = vpop.f32.mrb[112].mxu1  ;;  %2045 = vmatprep.mubr.bf16.mxu0 %v1309_v2 }
 0x21b   :  { %v1104_v4 = vmax.f32 %v967_v3, 0.0  ;;  %v969_v5 = vpop.f32.mrb[113].mxu1  ;;  %2046 = vmatmul.mubr.bf16.gmra.mrb[44].mxu0 %v1308_v1 }
 0x21c   :  { %v1105_v8 = vmax.f32 %v969_v5, 0.0  ;;  %v971_v9 = vpop.f32.mrb[114].mxu1 }
 0x21d   :  { %1232 = vst [vmem:[%s4234_s3 + $0x310] sm:$0xff] %v1104_v4  ;;  %v1108_v10 = vmax.f32 %v971_v9, 0.0  ;;  %v973_v11 = vpop.f32.mrb[115].mxu1 }
 0x21e   :  { %1233 = vst [vmem:[%s4234_s3 + $0x318] sm:$0xff] %v1105_v8  ;;  %v1109_v12 = vmax.f32 %v973_v11, 0.0 }
 0x21f   :  { %1236 = vst [vmem:[%s4234_s3 + $0x330] sm:$0xff] %v1108_v10  ;;  %v1312_v13 = vpack.c.bf16 %v1108_v10, %v1104_v4 }
 0x220   :  { %1237 = vst [vmem:[%s4234_s3 + $0x338] sm:$0xff] %v1109_v12  ;;  %v1313_v34 = vpack.c.bf16 %v1109_v12, %v1105_v8 }
 0x222   :  { %v977_v36 = vpop.f32.mrb[116].mxu1  ;;  %2055 = vmatprep.mubr.bf16.mxu0 %v1313_v34 }
 0x223   :  { %v1112_v40 = vmax.f32 %v977_v36, 0.0  ;;  %v979_v41 = vpop.f32.mrb[117].mxu1  ;;  %2056 = vmatmul.mubr.bf16.gmra.mrb[48].mxu0 %v1312_v13 }
 0x224   :  { %v1113_v46 = vmax.f32 %v979_v41, 0.0  ;;  %v981_v47 = vpop.f32.mrb[118].mxu1 }
 0x225   :  { %1240 = vst [vmem:[%s4234_s3 + $0x350] sm:$0xff] %v1112_v40  ;;  %v1116_v52 = vmax.f32 %v981_v47, 0.0  ;;  %v983_v53 = vpop.f32.mrb[119].mxu1 }
 0x226   :  { %1241 = vst [vmem:[%s4234_s3 + $0x358] sm:$0xff] %v1113_v46  ;;  %v1117_v60 = vmax.f32 %v983_v53, 0.0 }
 0x227   :  { %1244 = vst [vmem:[%s4234_s3 + $0x370] sm:$0xff] %v1116_v52  ;;  %v1316_v61 = vpack.c.bf16 %v1116_v52, %v1112_v40 }
 0x228   :  { %1245 = vst [vmem:[%s4234_s3 + $0x378] sm:$0xff] %v1117_v60  ;;  %v1317_v14 = vpack.c.bf16 %v1117_v60, %v1113_v46 }
 0x22a   :  { %v987_v6 = vpop.f32.mrb[120].mxu1  ;;  %2065 = vmatprep.mubr.bf16.mxu0 %v1317_v14 }
 0x22b   :  { %v1120_v7 = vmax.f32 %v987_v6, 0.0  ;;  %v989_v15 = vpop.f32.mrb[121].mxu1  ;;  %2066 = vmatmul.mubr.bf16.gmra.mrb[52].mxu0 %v1316_v61 }
 0x22c   :  { %v1121_v16 = vmax.f32 %v989_v15, 0.0  ;;  %v991_v17 = vpop.f32.mrb[122].mxu1 }
 0x22d   :  { %1248 = vst [vmem:[%s4234_s3 + $0x390] sm:$0xff] %v1120_v7  ;;  %v1124_v18 = vmax.f32 %v991_v17, 0.0  ;;  %v993_v19 = vpop.f32.mrb[123].mxu1 }
 0x22e   :  { %1249 = vst [vmem:[%s4234_s3 + $0x398] sm:$0xff] %v1121_v16  ;;  %v1125_v20 = vmax.f32 %v993_v19, 0.0 }
 0x22f   :  { %1252 = vst [vmem:[%s4234_s3 + $0x3b0] sm:$0xff] %v1124_v18  ;;  %v1320_v21 = vpack.c.bf16 %v1124_v18, %v1120_v7 }
 0x230   :  { %1253 = vst [vmem:[%s4234_s3 + $0x3b8] sm:$0xff] %v1125_v20  ;;  %v1321_v22 = vpack.c.bf16 %v1125_v20, %v1121_v16 }
 0x232   :  { %v997_v23 = vpop.f32.mrb[124].mxu1  ;;  %2075 = vmatprep.mubr.bf16.mxu0 %v1321_v22 }
 0x233   :  { %v1128_v24 = vmax.f32 %v997_v23, 0.0  ;;  %v999_v25 = vpop.f32.mrb[125].mxu1  ;;  %2076 = vmatmul.mubr.bf16.gmra.mrb[56].mxu0 %v1320_v21 }
 0x234   :  { %v1129_v26 = vmax.f32 %v999_v25, 0.0  ;;  %v1001_v27 = vpop.f32.mrb[126].mxu1 }
 0x235   :  { %1256 = vst [vmem:[%s4234_s3 + $0x3d0] sm:$0xff] %v1128_v24  ;;  %v1132_v28 = vmax.f32 %v1001_v27, 0.0  ;;  %v1003_v29 = vpop.f32.mrb[127].mxu1 }
 0x236   :  { %1257 = vst [vmem:[%s4234_s3 + $0x3d8] sm:$0xff] %v1129_v26  ;;  %v1133_v30 = vmax.f32 %v1003_v29, 0.0 }
 0x237   :  { %1260 = vst [vmem:[%s4234_s3 + $0x3f0] sm:$0xff] %v1132_v28  ;;  %v1324_v31 = vpack.c.bf16 %v1132_v28, %v1128_v24 }
 0x238   :  { %1261 = vst [vmem:[%s4234_s3 + $0x3f8] sm:$0xff] %v1133_v30  ;;  %v1325_v32 = vpack.c.bf16 %v1133_v30, %v1129_v26 }
 0x23a   :  { %2085 = vmatprep.mubr.bf16.mxu0 %v1325_v32 }
 0x23b   :  { %2086 = vmatmul.mubr.bf16.gmra.mrb[60].mxu0 %v1324_v31 }
 0x296   :  { %v1937_v33 = vpop.f32.mrb[0].mxu0 }
 0x297   :  { %v2714_v35 = vmul.f32 -1.442695, %v1937_v33  ;;  %v1939_v37 = vpop.f32.mrb[1].mxu0 }
 0x298   :  { %v2715_v38 = vmul.f32 -1.442695, %v1939_v37  ;;  %v1941_v39 = vpop.f32.mrb[2].mxu0 }
 0x299   :  { %3088 = vpow2.f32 %v2714_v35  ;;  %v2716_v42 = vmul.f32 -1.442695, %v1941_v39  ;;  %v1943_v43 = vpop.f32.mrb[3].mxu0 }
 0x29a   :  { %3090 = vpow2.f32 %v2715_v38  ;;  %v2717_v44 = vmul.f32 -1.442695, %v1943_v43 }
 0x29b   :  { %3092 = vpow2.f32 %v2716_v42 }
 0x29c   :  { %3094 = vpow2.f32 %v2717_v44 }
 0x29e   :  { %v1947_v45 = vpop.f32.mrb[4].mxu0 }
 0x29f   :  { %v2718_v48 = vmul.f32 -1.442695, %v1947_v45  ;;  %v1949_v49 = vpop.f32.mrb[5].mxu0 }
 0x2a0   :  { %v2719_v50 = vmul.f32 -1.442695, %v1949_v49  ;;  %v1951_v51 = vpop.f32.mrb[6].mxu0 }
 0x2a1   :  { %3096 = vpow2.f32 %v2718_v48  ;;  %v2720_v54 = vmul.f32 -1.442695, %v1951_v51  ;;  %v1953_v55 = vpop.f32.mrb[7].mxu0 }
 0x2a2   :  { %3098 = vpow2.f32 %v2719_v50  ;;  %v2721_v56 = vmul.f32 -1.442695, %v1953_v55 }
 0x2a3   :  { %v3089_v57 = vpop.eup %3088  ;;  %3100 = vpow2.f32 %v2720_v54 }
 0x2a4   :  { %v3091_v58 = vpop.eup %3090  ;;  %v2288_v59 = vadd.f32 1.0, %v3089_v57  ;;  %3102 = vpow2.f32 %v2721_v56 }
 0x2a5   :  { %v3093_v62 = vpop.eup %3092  ;;  %v2289_v63 = vadd.f32 1.0, %v3091_v58 }
 0x2a6   :  { %v3095_v0 = vpop.eup %3094  ;;  %3104 = vrcp.f32 %v2288_v59  ;;  %v2290_v1 = vadd.f32 1.0, %v3093_v62  ;;  %v1957_v2 = vpop.f32.mrb[8].mxu0 }
 0x2a7   :  { %3106 = vrcp.f32 %v2289_v63  ;;  %v2291_v3 = vadd.f32 1.0, %v3095_v0  ;;  %v2722_v4 = vmul.f32 -1.442695, %v1957_v2  ;;  %v1959_v5 = vpop.f32.mrb[9].mxu0 }
 0x2a8   :  { %3108 = vrcp.f32 %v2290_v1  ;;  %v2723_v8 = vmul.f32 -1.442695, %v1959_v5  ;;  %v1961_v9 = vpop.f32.mrb[10].mxu0 }
 0x2a9   :  { %3110 = vrcp.f32 %v2291_v3  ;;  %v2724_v10 = vmul.f32 -1.442695, %v1961_v9  ;;  %v1963_v11 = vpop.f32.mrb[11].mxu0 }
 0x2aa   :  { %3112 = vpow2.f32 %v2722_v4  ;;  %v2725_v12 = vmul.f32 -1.442695, %v1963_v11 }
 0x2ab   :  { %v3097_v13 = vpop.eup %3096  ;;  %3114 = vpow2.f32 %v2723_v8 }
 0x2ac   :  { %v3099_v34 = vpop.eup %3098  ;;  %v2292_v36 = vadd.f32 1.0, %v3097_v13  ;;  %3116 = vpow2.f32 %v2724_v10 }
 0x2ad   :  { %v3101_v40 = vpop.eup %3100  ;;  %v2293_v41 = vadd.f32 1.0, %v3099_v34  ;;  %3118 = vpow2.f32 %v2725_v12 }
 0x2ae   :  { %v3103_v46 = vpop.eup %3102  ;;  %3120 = vrcp.f32 %v2292_v36  ;;  %v2294_v47 = vadd.f32 1.0, %v3101_v40  ;;  %v1967_v52 = vpop.f32.mrb[12].mxu0 }
 0x2af   :  { %3122 = vrcp.f32 %v2293_v41  ;;  %v2295_v53 = vadd.f32 1.0, %v3103_v46  ;;  %v2726_v60 = vmul.f32 -1.442695, %v1967_v52  ;;  %v1969_v61 = vpop.f32.mrb[13].mxu0 }
 0x2b0   :  { %v3105_v14 = vpop.eup %3104  ;;  %3124 = vrcp.f32 %v2294_v47  ;;  %v2727_v6 = vmul.f32 -1.442695, %v1969_v61  ;;  %v1971_v7 = vpop.f32.mrb[14].mxu0 }
 0x2b1   :  { %v3107_v15 = vpop.eup %3106  ;;  %2480 = vst [vmem:[%s4235_s4] sm:$0xff] %v3105_v14  ;;  %3126 = vrcp.f32 %v2295_v53  ;;  %v2728_v16 = vmul.f32 -1.442695, %v1971_v7  ;;  %v1973_v17 = vpop.f32.mrb[15].mxu0 }
 0x2b2   :  { %v3109_v18 = vpop.eup %3108  ;;  %2481 = vst [vmem:[%s4235_s4 + $0x8] sm:$0xff] %v3107_v15  ;;  %3128 = vpow2.f32 %v2726_v60  ;;  %v2729_v19 = vmul.f32 -1.442695, %v1973_v17 }
 0x2b3   :  { %v3111_v20 = vpop.eup %3110  ;;  %2482 = vst [vmem:[%s4235_s4 + $0x10] sm:$0xff] %v3109_v18  ;;  %3130 = vpow2.f32 %v2727_v6 }
 0x2b4   :  { %v3113_v21 = vpop.eup %3112  ;;  %2483 = vst [vmem:[%s4235_s4 + $0x18] sm:$0xff] %v3111_v20  ;;  %3132 = vpow2.f32 %v2728_v16 }
 0x2b5   :  { %v3115_v22 = vpop.eup %3114  ;;  %v2296_v23 = vadd.f32 1.0, %v3113_v21  ;;  %3134 = vpow2.f32 %v2729_v19 }
 0x2b6   :  { %v3117_v24 = vpop.eup %3116  ;;  %v2297_v25 = vadd.f32 1.0, %v3115_v22  ;;  %v1977_v26 = vpop.f32.mrb[16].mxu0 }
 0x2b7   :  { %v3119_v27 = vpop.eup %3118  ;;  %3136 = vrcp.f32 %v2296_v23  ;;  %v2298_v28 = vadd.f32 1.0, %v3117_v24  ;;  %v2730_v29 = vmul.f32 -1.442695, %v1977_v26  ;;  %v1979_v30 = vpop.f32.mrb[17].mxu0 }
 0x2b8   :  { %v3121_v31 = vpop.eup %3120  ;;  %3138 = vrcp.f32 %v2297_v25  ;;  %v2299_v32 = vadd.f32 1.0, %v3119_v27  ;;  %v2731_v33 = vmul.f32 -1.442695, %v1979_v30  ;;  %v1981_v35 = vpop.f32.mrb[18].mxu0 }
 0x2b9   :  { %v3123_v37 = vpop.eup %3122  ;;  %2484 = vst [vmem:[%s4235_s4 + $0x20] sm:$0xff] %v3121_v31  ;;  %3140 = vrcp.f32 %v2298_v28  ;;  %v2732_v38 = vmul.f32 -1.442695, %v1981_v35  ;;  %v1983_v39 = vpop.f32.mrb[19].mxu0 }
 0x2ba   :  { %v3125_v42 = vpop.eup %3124  ;;  %2485 = vst [vmem:[%s4235_s4 + $0x28] sm:$0xff] %v3123_v37  ;;  %3142 = vrcp.f32 %v2299_v32  ;;  %v2733_v43 = vmul.f32 -1.442695, %v1983_v39 }
 0x2bb   :  { %v3127_v44 = vpop.eup %3126  ;;  %2486 = vst [vmem:[%s4235_s4 + $0x30] sm:$0xff] %v3125_v42  ;;  %3144 = vpow2.f32 %v2730_v29 }
 0x2bc   :  { %v3129_v45 = vpop.eup %3128  ;;  %2487 = vst [vmem:[%s4235_s4 + $0x38] sm:$0xff] %v3127_v44  ;;  %3146 = vpow2.f32 %v2731_v33 }
 0x2bd   :  { %v3131_v48 = vpop.eup %3130  ;;  %v2300_v49 = vadd.f32 1.0, %v3129_v45  ;;  %3148 = vpow2.f32 %v2732_v38 }
 0x2be   :  { %v3133_v50 = vpop.eup %3132  ;;  %v2301_v51 = vadd.f32 1.0, %v3131_v48  ;;  %3150 = vpow2.f32 %v2733_v43  ;;  %v1987_v54 = vpop.f32.mrb[20].mxu0 }
 0x2bf   :  { %v3135_v55 = vpop.eup %3134  ;;  %3152 = vrcp.f32 %v2300_v49  ;;  %v2302_v56 = vadd.f32 1.0, %v3133_v50  ;;  %v2734_v57 = vmul.f32 -1.442695, %v1987_v54  ;;  %v1989_v58 = vpop.f32.mrb[21].mxu0 }
 0x2c0   :  { %3154 = vrcp.f32 %v2301_v51  ;;  %v2303_v59 = vadd.f32 1.0, %v3135_v55  ;;  %v2735_v62 = vmul.f32 -1.442695, %v1989_v58  ;;  %v1991_v63 = vpop.f32.mrb[22].mxu0 }
 0x2c1   :  { %v3137_v0 = vpop.eup %3136  ;;  %3156 = vrcp.f32 %v2302_v56  ;;  %v2736_v1 = vmul.f32 -1.442695, %v1991_v63  ;;  %v1993_v2 = vpop.f32.mrb[23].mxu0 }
 0x2c2   :  { %v3139_v3 = vpop.eup %3138  ;;  %2488 = vst [vmem:[%s4235_s4 + $0x40] sm:$0xff] %v3137_v0  ;;  %3158 = vrcp.f32 %v2303_v59  ;;  %v2737_v4 = vmul.f32 -1.442695, %v1993_v2 }
 0x2c3   :  { %v3141_v5 = vpop.eup %3140  ;;  %2489 = vst [vmem:[%s4235_s4 + $0x48] sm:$0xff] %v3139_v3  ;;  %3160 = vpow2.f32 %v2734_v57 }
 0x2c4   :  { %v3143_v8 = vpop.eup %3142  ;;  %2490 = vst [vmem:[%s4235_s4 + $0x50] sm:$0xff] %v3141_v5  ;;  %3162 = vpow2.f32 %v2735_v62 }
 0x2c5   :  { %v3145_v9 = vpop.eup %3144  ;;  %2491 = vst [vmem:[%s4235_s4 + $0x58] sm:$0xff] %v3143_v8  ;;  %3164 = vpow2.f32 %v2736_v1 }
 0x2c6   :  { %v3147_v10 = vpop.eup %3146  ;;  %v2304_v11 = vadd.f32 1.0, %v3145_v9  ;;  %3166 = vpow2.f32 %v2737_v4  ;;  %v1997_v12 = vpop.f32.mrb[24].mxu0 }
 0x2c7   :  { %v3149_v13 = vpop.eup %3148  ;;  %v2305_v34 = vadd.f32 1.0, %v3147_v10  ;;  %v1999_v36 = vpop.f32.mrb[25].mxu0  ;;  %v2738_v46 = vmul.f32 -1.442695, %v1997_v12 }
 0x2c8   :  { %v3151_v40 = vpop.eup %3150  ;;  %3168 = vrcp.f32 %v2304_v11  ;;  %v2306_v41 = vadd.f32 1.0, %v3149_v13  ;;  %v2001_v47 = vpop.f32.mrb[26].mxu0  ;;  %v2739_v60 = vmul.f32 -1.442695, %v1999_v36 }
 0x2c9   :  { %v3153_v52 = vpop.eup %3152  ;;  %3170 = vrcp.f32 %v2305_v34  ;;  %v2307_v53 = vadd.f32 1.0, %v3151_v40  ;;  %v2003_v61 = vpop.f32.mrb[27].mxu0  ;;  %v2740_v6 = vmul.f32 -1.442695, %v2001_v47 }
 0x2ca   :  { %v3155_v14 = vpop.eup %3154  ;;  %2492 = vst [vmem:[%s4235_s4 + $0x60] sm:$0xff] %v3153_v52  ;;  %3172 = vrcp.f32 %v2306_v41  ;;  %v2741_v15 = vmul.f32 -1.442695, %v2003_v61 }
 0x2cb   :  { %v3157_v7 = vpop.eup %3156  ;;  %2493 = vst [vmem:[%s4235_s4 + $0x68] sm:$0xff] %v3155_v14  ;;  %3174 = vrcp.f32 %v2307_v53 }
 0x2cc   :  { %v3159_v16 = vpop.eup %3158  ;;  %2494 = vst [vmem:[%s4235_s4 + $0x70] sm:$0xff] %v3157_v7  ;;  %3176 = vpow2.f32 %v2738_v46 }
 0x2cd   :  { %v3161_v17 = vpop.eup %3160  ;;  %2495 = vst [vmem:[%s4235_s4 + $0x78] sm:$0xff] %v3159_v16  ;;  %3178 = vpow2.f32 %v2739_v60 }
 0x2ce   :  { %v3163_v18 = vpop.eup %3162  ;;  %v2308_v19 = vadd.f32 1.0, %v3161_v17  ;;  %3180 = vpow2.f32 %v2740_v6  ;;  %v2007_v20 = vpop.f32.mrb[28].mxu0 }
 0x2cf   :  { %v3165_v21 = vpop.eup %3164  ;;  %v2309_v22 = vadd.f32 1.0, %v3163_v18  ;;  %3182 = vpow2.f32 %v2741_v15  ;;  %v2009_v23 = vpop.f32.mrb[29].mxu0  ;;  %v2742_v26 = vmul.f32 -1.442695, %v2007_v20 }
 0x2d0   :  { %v3167_v24 = vpop.eup %3166  ;;  %3184 = vrcp.f32 %v2308_v19  ;;  %v2310_v25 = vadd.f32 1.0, %v3165_v21  ;;  %v2011_v27 = vpop.f32.mrb[30].mxu0  ;;  %v2743_v29 = vmul.f32 -1.442695, %v2009_v23 }
 0x2d1   :  { %3186 = vrcp.f32 %v2309_v22  ;;  %v2311_v28 = vadd.f32 1.0, %v3167_v24  ;;  %v2013_v30 = vpop.f32.mrb[31].mxu0  ;;  %v2744_v32 = vmul.f32 -1.442695, %v2011_v27 }
 0x2d2   :  { %v3169_v31 = vpop.eup %3168  ;;  %3188 = vrcp.f32 %v2310_v25  ;;  %v2745_v35 = vmul.f32 -1.442695, %v2013_v30 }
 0x2d3   :  { %v3171_v33 = vpop.eup %3170  ;;  %2496 = vst [vmem:[%s4235_s4 + $0x80] sm:$0xff] %v3169_v31  ;;  %3190 = vrcp.f32 %v2311_v28 }
 0x2d4   :  { %v3173_v37 = vpop.eup %3172  ;;  %2497 = vst [vmem:[%s4235_s4 + $0x88] sm:$0xff] %v3171_v33  ;;  %3192 = vpow2.f32 %v2742_v26 }
 0x2d5   :  { %v3175_v38 = vpop.eup %3174  ;;  %2498 = vst [vmem:[%s4235_s4 + $0x90] sm:$0xff] %v3173_v37  ;;  %3194 = vpow2.f32 %v2743_v29 }
 0x2d6   :  { %v3177_v39 = vpop.eup %3176  ;;  %2499 = vst [vmem:[%s4235_s4 + $0x98] sm:$0xff] %v3175_v38  ;;  %3196 = vpow2.f32 %v2744_v32  ;;  %v2017_v42 = vpop.f32.mrb[32].mxu0 }
 0x2d7   :  { %v3179_v43 = vpop.eup %3178  ;;  %v2312_v44 = vadd.f32 1.0, %v3177_v39  ;;  %3198 = vpow2.f32 %v2745_v35  ;;  %v2019_v45 = vpop.f32.mrb[33].mxu0  ;;  %v2746_v55 = vmul.f32 -1.442695, %v2017_v42 }
 0x2d8   :  { %v3181_v48 = vpop.eup %3180  ;;  %v2313_v49 = vadd.f32 1.0, %v3179_v43  ;;  %v2021_v50 = vpop.f32.mrb[34].mxu0  ;;  %v2747_v59 = vmul.f32 -1.442695, %v2019_v45 }
 0x2d9   :  { %v3183_v51 = vpop.eup %3182  ;;  %3200 = vrcp.f32 %v2312_v44  ;;  %v2314_v54 = vadd.f32 1.0, %v3181_v48  ;;  %v2023_v56 = vpop.f32.mrb[35].mxu0  ;;  %v2748_v63 = vmul.f32 -1.442695, %v2021_v50 }
 0x2da   :  { %v3185_v57 = vpop.eup %3184  ;;  %3202 = vrcp.f32 %v2313_v49  ;;  %v2315_v58 = vadd.f32 1.0, %v3183_v51  ;;  %v2749_v1 = vmul.f32 -1.442695, %v2023_v56 }
 0x2db   :  { %v3187_v62 = vpop.eup %3186  ;;  %2500 = vst [vmem:[%s4235_s4 + $0xa0] sm:$0xff] %v3185_v57  ;;  %3204 = vrcp.f32 %v2314_v54 }
 0x2dc   :  { %v3189_v0 = vpop.eup %3188  ;;  %2501 = vst [vmem:[%s4235_s4 + $0xa8] sm:$0xff] %v3187_v62  ;;  %3206 = vrcp.f32 %v2315_v58 }
 0x2dd   :  { %v3191_v2 = vpop.eup %3190  ;;  %2502 = vst [vmem:[%s4235_s4 + $0xb0] sm:$0xff] %v3189_v0  ;;  %3208 = vpow2.f32 %v2746_v55 }
 0x2de   :  { %v3193_v3 = vpop.eup %3192  ;;  %2503 = vst [vmem:[%s4235_s4 + $0xb8] sm:$0xff] %v3191_v2  ;;  %3210 = vpow2.f32 %v2747_v59  ;;  %v2027_v4 = vpop.f32.mrb[36].mxu0 }
 0x2df   :  { %v3195_v5 = vpop.eup %3194  ;;  %v2316_v8 = vadd.f32 1.0, %v3193_v3  ;;  %3212 = vpow2.f32 %v2748_v63  ;;  %v2029_v9 = vpop.f32.mrb[37].mxu0  ;;  %v2750_v36 = vmul.f32 -1.442695, %v2027_v4 }
 0x2e0   :  { %v3197_v10 = vpop.eup %3196  ;;  %v2317_v11 = vadd.f32 1.0, %v3195_v5  ;;  %3214 = vpow2.f32 %v2749_v1  ;;  %v2031_v12 = vpop.f32.mrb[38].mxu0  ;;  %v2751_v46 = vmul.f32 -1.442695, %v2029_v9 }
 0x2e1   :  { %v3199_v13 = vpop.eup %3198  ;;  %3216 = vrcp.f32 %v2316_v8  ;;  %v2318_v34 = vadd.f32 1.0, %v3197_v10  ;;  %v2033_v40 = vpop.f32.mrb[39].mxu0  ;;  %v2752_v52 = vmul.f32 -1.442695, %v2031_v12 }
 0x2e2   :  { %3218 = vrcp.f32 %v2317_v11  ;;  %v2319_v41 = vadd.f32 1.0, %v3199_v13  ;;  %v2753_v60 = vmul.f32 -1.442695, %v2033_v40 }
 0x2e3   :  { %v3201_v47 = vpop.eup %3200  ;;  %3220 = vrcp.f32 %v2318_v34 }
 0x2e4   :  { %v3203_v53 = vpop.eup %3202  ;;  %2504 = vst [vmem:[%s4235_s4 + $0xc0] sm:$0xff] %v3201_v47  ;;  %3222 = vrcp.f32 %v2319_v41 }
 0x2e5   :  { %v3205_v61 = vpop.eup %3204  ;;  %2505 = vst [vmem:[%s4235_s4 + $0xc8] sm:$0xff] %v3203_v53  ;;  %3224 = vpow2.f32 %v2750_v36 }
 0x2e6   :  { %v3207_v14 = vpop.eup %3206  ;;  %2506 = vst [vmem:[%s4235_s4 + $0xd0] sm:$0xff] %v3205_v61  ;;  %3226 = vpow2.f32 %v2751_v46  ;;  %v2037_v6 = vpop.f32.mrb[40].mxu0 }
 0x2e7   :  { %v3209_v7 = vpop.eup %3208  ;;  %2507 = vst [vmem:[%s4235_s4 + $0xd8] sm:$0xff] %v3207_v14  ;;  %3228 = vpow2.f32 %v2752_v52  ;;  %v2754_v15 = vmul.f32 -1.442695, %v2037_v6  ;;  %v2039_v16 = vpop.f32.mrb[41].mxu0 }
 0x2e8   :  { %v3211_v17 = vpop.eup %3210  ;;  %v2320_v18 = vadd.f32 1.0, %v3209_v7  ;;  %3230 = vpow2.f32 %v2753_v60  ;;  %v2041_v19 = vpop.f32.mrb[42].mxu0  ;;  %v2755_v25 = vmul.f32 -1.442695, %v2039_v16 }
 0x2e9   :  { %v3213_v20 = vpop.eup %3212  ;;  %v2321_v21 = vadd.f32 1.0, %v3211_v17  ;;  %3232 = vpow2.f32 %v2754_v15  ;;  %v2043_v22 = vpop.f32.mrb[43].mxu0  ;;  %v2756_v28 = vmul.f32 -1.442695, %v2041_v19 }
 0x2ea   :  { %v3215_v23 = vpop.eup %3214  ;;  %3234 = vrcp.f32 %v2320_v18  ;;  %v2322_v24 = vadd.f32 1.0, %v3213_v20  ;;  %v2757_v30 = vmul.f32 -1.442695, %v2043_v22 }
 0x2eb   :  { %v3217_v26 = vpop.eup %3216  ;;  %3236 = vrcp.f32 %v2321_v21  ;;  %v2323_v27 = vadd.f32 1.0, %v3215_v23 }
 0x2ec   :  { %v3219_v29 = vpop.eup %3218  ;;  %2508 = vst [vmem:[%s4235_s4 + $0xe0] sm:$0xff] %v3217_v26  ;;  %3238 = vrcp.f32 %v2322_v24 }
 0x2ed   :  { %v3221_v31 = vpop.eup %3220  ;;  %2509 = vst [vmem:[%s4235_s4 + $0xe8] sm:$0xff] %v3219_v29  ;;  %3240 = vrcp.f32 %v2323_v27 }
 0x2ee   :  { %v3223_v32 = vpop.eup %3222  ;;  %2510 = vst [vmem:[%s4235_s4 + $0xf0] sm:$0xff] %v3221_v31  ;;  %3242 = vpow2.f32 %v2755_v25  ;;  %v2047_v33 = vpop.f32.mrb[44].mxu0 }
 0x2ef   :  { %v3225_v35 = vpop.eup %3224  ;;  %2511 = vst [vmem:[%s4235_s4 + $0xf8] sm:$0xff] %v3223_v32  ;;  %3244 = vpow2.f32 %v2756_v28  ;;  %v2758_v37 = vmul.f32 -1.442695, %v2047_v33  ;;  %v2049_v38 = vpop.f32.mrb[45].mxu0 }
 0x2f0   :  { %v3227_v39 = vpop.eup %3226  ;;  %v2324_v42 = vadd.f32 1.0, %v3225_v35  ;;  %3246 = vpow2.f32 %v2757_v30  ;;  %v2051_v43 = vpop.f32.mrb[46].mxu0  ;;  %v2759_v55 = vmul.f32 -1.442695, %v2049_v38 }
 0x2f1   :  { %v3229_v44 = vpop.eup %3228  ;;  %v2325_v45 = vadd.f32 1.0, %v3227_v39  ;;  %3248 = vpow2.f32 %v2758_v37  ;;  %v2053_v48 = vpop.f32.mrb[47].mxu0  ;;  %v2760_v58 = vmul.f32 -1.442695, %v2051_v43 }
 0x2f2   :  { %v3231_v49 = vpop.eup %3230  ;;  %3250 = vrcp.f32 %v2324_v42  ;;  %v2326_v50 = vadd.f32 1.0, %v3229_v44  ;;  %v2761_v62 = vmul.f32 -1.442695, %v2053_v48 }
 0x2f3   :  { %v3233_v51 = vpop.eup %3232  ;;  %3252 = vrcp.f32 %v2325_v45  ;;  %v2327_v54 = vadd.f32 1.0, %v3231_v49 }
 0x2f4   :  { %v3235_v56 = vpop.eup %3234  ;;  %3254 = vrcp.f32 %v2326_v50  ;;  %v2328_v57 = vadd.f32 1.0, %v3233_v51 }
 0x2f5   :  { %v3237_v59 = vpop.eup %3236  ;;  %2512 = vst [vmem:[%s4235_s4 + $0x100] sm:$0xff] %v3235_v56  ;;  %3256 = vrcp.f32 %v2327_v54 }
 0x2f6   :  { %v3239_v63 = vpop.eup %3238  ;;  %2513 = vst [vmem:[%s4235_s4 + $0x108] sm:$0xff] %v3237_v59  ;;  %3258 = vrcp.f32 %v2328_v57  ;;  %v2057_v0 = vpop.f32.mrb[48].mxu0 }
 0x2f7   :  { %v3241_v1 = vpop.eup %3240  ;;  %2514 = vst [vmem:[%s4235_s4 + $0x110] sm:$0xff] %v3239_v63  ;;  %3260 = vpow2.f32 %v2759_v55  ;;  %v2762_v2 = vmul.f32 -1.442695, %v2057_v0  ;;  %v2059_v3 = vpop.f32.mrb[49].mxu0 }
 0x2f8   :  { %v3243_v4 = vpop.eup %3242  ;;  %2515 = vst [vmem:[%s4235_s4 + $0x118] sm:$0xff] %v3241_v1  ;;  %3262 = vpow2.f32 %v2760_v58  ;;  %v2061_v5 = vpop.f32.mrb[50].mxu0  ;;  %v2763_v36 = vmul.f32 -1.442695, %v2059_v3 }
 0x2f9   :  { %v3245_v8 = vpop.eup %3244  ;;  %v2329_v9 = vadd.f32 1.0, %v3243_v4  ;;  %3264 = vpow2.f32 %v2761_v62  ;;  %v2063_v10 = vpop.f32.mrb[51].mxu0  ;;  %v2764_v46 = vmul.f32 -1.442695, %v2061_v5 }
 0x2fa   :  { %v3247_v11 = vpop.eup %3246  ;;  %v2330_v12 = vadd.f32 1.0, %v3245_v8  ;;  %3266 = vpow2.f32 %v2762_v2  ;;  %v2765_v52 = vmul.f32 -1.442695, %v2063_v10 }
 0x2fb   :  { %v3249_v13 = vpop.eup %3248  ;;  %3268 = vrcp.f32 %v2329_v9  ;;  %v2331_v34 = vadd.f32 1.0, %v3247_v11 }
 0x2fc   :  { %v3251_v40 = vpop.eup %3250  ;;  %3270 = vrcp.f32 %v2330_v12  ;;  %v2332_v41 = vadd.f32 1.0, %v3249_v13 }
 0x2fd   :  { %v3253_v47 = vpop.eup %3252  ;;  %2516 = vst [vmem:[%s4235_s4 + $0x120] sm:$0xff] %v3251_v40  ;;  %3272 = vrcp.f32 %v2331_v34 }
 0x2fe   :  { %v3255_v53 = vpop.eup %3254  ;;  %2517 = vst [vmem:[%s4235_s4 + $0x128] sm:$0xff] %v3253_v47  ;;  %3274 = vrcp.f32 %v2332_v41  ;;  %v2067_v60 = vpop.f32.mrb[52].mxu0 }
 0x2ff   :  { %v3257_v61 = vpop.eup %3256  ;;  %2518 = vst [vmem:[%s4235_s4 + $0x130] sm:$0xff] %v3255_v53  ;;  %3276 = vpow2.f32 %v2763_v36  ;;  %v2766_v14 = vmul.f32 -1.442695, %v2067_v60  ;;  %v2069_v6 = vpop.f32.mrb[53].mxu0 }
 0x300   :  { %v3259_v7 = vpop.eup %3258  ;;  %2519 = vst [vmem:[%s4235_s4 + $0x138] sm:$0xff] %v3257_v61  ;;  %3278 = vpow2.f32 %v2764_v46  ;;  %v2767_v15 = vmul.f32 -1.442695, %v2069_v6  ;;  %v2071_v16 = vpop.f32.mrb[54].mxu0 }
 0x301   :  { %v3261_v17 = vpop.eup %3260  ;;  %2520 = vst [vmem:[%s4235_s4 + $0x140] sm:$0xff] %v3259_v7  ;;  %3280 = vpow2.f32 %v2765_v52  ;;  %v2073_v18 = vpop.f32.mrb[55].mxu0  ;;  %v2768_v25 = vmul.f32 -1.442695, %v2071_v16 }
 0x302   :  { %v3263_v19 = vpop.eup %3262  ;;  %v2333_v20 = vadd.f32 1.0, %v3261_v17  ;;  %3282 = vpow2.f32 %v2766_v14  ;;  %v2769_v28 = vmul.f32 -1.442695, %v2073_v18 }
 0x303   :  { %v3265_v21 = vpop.eup %3264  ;;  %v2334_v22 = vadd.f32 1.0, %v3263_v19  ;;  %3284 = vpow2.f32 %v2767_v15 }
 0x304   :  { %v3267_v23 = vpop.eup %3266  ;;  %3286 = vrcp.f32 %v2333_v20  ;;  %v2335_v24 = vadd.f32 1.0, %v3265_v21 }
 0x305   :  { %v3269_v26 = vpop.eup %3268  ;;  %3288 = vrcp.f32 %v2334_v22  ;;  %v2336_v27 = vadd.f32 1.0, %v3267_v23 }
 0x306   :  { %v3271_v29 = vpop.eup %3270  ;;  %2521 = vst [vmem:[%s4235_s4 + $0x148] sm:$0xff] %v3269_v26  ;;  %3290 = vrcp.f32 %v2335_v24  ;;  %v2077_v30 = vpop.f32.mrb[56].mxu0 }
 0x307   :  { %v3273_v31 = vpop.eup %3272  ;;  %2522 = vst [vmem:[%s4235_s4 + $0x150] sm:$0xff] %v3271_v29  ;;  %3292 = vrcp.f32 %v2336_v27  ;;  %v2770_v32 = vmul.f32 -1.442695, %v2077_v30  ;;  %v2079_v33 = vpop.f32.mrb[57].mxu0 }
 0x308   :  { %v3275_v35 = vpop.eup %3274  ;;  %2523 = vst [vmem:[%s4235_s4 + $0x158] sm:$0xff] %v3273_v31  ;;  %3294 = vpow2.f32 %v2768_v25  ;;  %v2771_v37 = vmul.f32 -1.442695, %v2079_v33  ;;  %v2081_v38 = vpop.f32.mrb[58].mxu0 }
 0x309   :  { %v3277_v39 = vpop.eup %3276  ;;  %2524 = vst [vmem:[%s4235_s4 + $0x160] sm:$0xff] %v3275_v35  ;;  %3296 = vpow2.f32 %v2769_v28  ;;  %v2083_v42 = vpop.f32.mrb[59].mxu0  ;;  %v2772_v55 = vmul.f32 -1.442695, %v2081_v38 }
 0x30a   :  { %v3279_v43 = vpop.eup %3278  ;;  %v2337_v44 = vadd.f32 1.0, %v3277_v39  ;;  %3298 = vpow2.f32 %v2770_v32  ;;  %v2773_v58 = vmul.f32 -1.442695, %v2083_v42 }
 0x30b   :  { %v3281_v45 = vpop.eup %3280  ;;  %v2338_v48 = vadd.f32 1.0, %v3279_v43  ;;  %3300 = vpow2.f32 %v2771_v37 }
 0x30c   :  { %v3283_v49 = vpop.eup %3282  ;;  %3302 = vrcp.f32 %v2337_v44  ;;  %v2339_v50 = vadd.f32 1.0, %v3281_v45 }
 0x30d   :  { %v3285_v51 = vpop.eup %3284  ;;  %3304 = vrcp.f32 %v2338_v48  ;;  %v2340_v54 = vadd.f32 1.0, %v3283_v49 }
 0x30e   :  { %v3287_v56 = vpop.eup %3286  ;;  %3306 = vrcp.f32 %v2339_v50  ;;  %v2341_v57 = vadd.f32 1.0, %v3285_v51  ;;  %v2087_v59 = vpop.f32.mrb[60].mxu0 }
 0x30f   :  { %v3289_v62 = vpop.eup %3288  ;;  %2525 = vst [vmem:[%s4235_s4 + $0x168] sm:$0xff] %v3287_v56  ;;  %3308 = vrcp.f32 %v2340_v54  ;;  %v2774_v63 = vmul.f32 -1.442695, %v2087_v59  ;;  %v2089_v0 = vpop.f32.mrb[61].mxu0 }
 0x310   :  { %v3291_v1 = vpop.eup %3290  ;;  %2526 = vst [vmem:[%s4235_s4 + $0x170] sm:$0xff] %v3289_v62  ;;  %3310 = vrcp.f32 %v2341_v57  ;;  %v2775_v2 = vmul.f32 -1.442695, %v2089_v0  ;;  %v2091_v3 = vpop.f32.mrb[62].mxu0 }
 0x311   :  { %v3293_v4 = vpop.eup %3292  ;;  %2527 = vst [vmem:[%s4235_s4 + $0x178] sm:$0xff] %v3291_v1  ;;  %3312 = vpow2.f32 %v2772_v55  ;;  %v2093_v5 = vpop.f32.mrb[63].mxu0  ;;  %v2776_v36 = vmul.f32 -1.442695, %v2091_v3 }
 0x312   :  { %v3295_v8 = vpop.eup %3294  ;;  %2528 = vst [vmem:[%s4235_s4 + $0x180] sm:$0xff] %v3293_v4  ;;  %3314 = vpow2.f32 %v2773_v58  ;;  %v2777_v46 = vmul.f32 -1.442695, %v2093_v5 }
 0x313   :  { %v3297_v9 = vpop.eup %3296  ;;  %v2342_v10 = vadd.f32 1.0, %v3295_v8  ;;  %3316 = vpow2.f32 %v2774_v63 }
 0x314   :  { %v3299_v11 = vpop.eup %3298  ;;  %v2343_v12 = vadd.f32 1.0, %v3297_v9  ;;  %3318 = vpow2.f32 %v2775_v2 }
 0x315   :  { %v3301_v13 = vpop.eup %3300  ;;  %3320 = vrcp.f32 %v2342_v10  ;;  %v2344_v34 = vadd.f32 1.0, %v3299_v11 }
 0x316   :  { %v3303_v40 = vpop.eup %3302  ;;  %3322 = vrcp.f32 %v2343_v12  ;;  %v2345_v41 = vadd.f32 1.0, %v3301_v13 }
 0x317   :  { %v3305_v47 = vpop.eup %3304  ;;  %2529 = vst [vmem:[%s4235_s4 + $0x188] sm:$0xff] %v3303_v40  ;;  %3324 = vrcp.f32 %v2344_v34 }
 0x318   :  { %v3307_v52 = vpop.eup %3306  ;;  %2530 = vst [vmem:[%s4235_s4 + $0x190] sm:$0xff] %v3305_v47  ;;  %3326 = vrcp.f32 %v2345_v41 }
 0x319   :  { %v3309_v53 = vpop.eup %3308  ;;  %2531 = vst [vmem:[%s4235_s4 + $0x198] sm:$0xff] %v3307_v52  ;;  %3328 = vpow2.f32 %v2776_v36 }
 0x31a   :  { %v3311_v60 = vpop.eup %3310  ;;  %2532 = vst [vmem:[%s4235_s4 + $0x1a0] sm:$0xff] %v3309_v53  ;;  %3330 = vpow2.f32 %v2777_v46 }
 0x31b   :  { %v3313_v61 = vpop.eup %3312  ;;  %2533 = vst [vmem:[%s4235_s4 + $0x1a8] sm:$0xff] %v3311_v60 }
 0x31c   :  { %v3315_v14 = vpop.eup %3314  ;;  %v2346_v6 = vadd.f32 1.0, %v3313_v61 }
 0x31d   :  { %v3317_v7 = vpop.eup %3316  ;;  %v2347_v15 = vadd.f32 1.0, %v3315_v14 }
 0x31e   :  { %v3319_v16 = vpop.eup %3318  ;;  %3332 = vrcp.f32 %v2346_v6  ;;  %v2348_v17 = vadd.f32 1.0, %v3317_v7 }
 0x31f   :  { %v3321_v18 = vpop.eup %3320  ;;  %3334 = vrcp.f32 %v2347_v15  ;;  %v2349_v19 = vadd.f32 1.0, %v3319_v16 }
 0x320   :  { %v3323_v20 = vpop.eup %3322  ;;  %2534 = vst [vmem:[%s4235_s4 + $0x1b0] sm:$0xff] %v3321_v18  ;;  %3336 = vrcp.f32 %v2348_v17 }
 0x321   :  { %v3325_v21 = vpop.eup %3324  ;;  %2535 = vst [vmem:[%s4235_s4 + $0x1b8] sm:$0xff] %v3323_v20  ;;  %3338 = vrcp.f32 %v2349_v19 }
 0x322   :  { %v3327_v22 = vpop.eup %3326  ;;  %2536 = vst [vmem:[%s4235_s4 + $0x1c0] sm:$0xff] %v3325_v21 }
 0x323   :  { %v3329_v23 = vpop.eup %3328  ;;  %2537 = vst [vmem:[%s4235_s4 + $0x1c8] sm:$0xff] %v3327_v22 }
 0x324   :  { %v3331_v24 = vpop.eup %3330  ;;  %v2350_v25 = vadd.f32 1.0, %v3329_v23 }
 0x325   :  { %v2351_v26 = vadd.f32 1.0, %v3331_v24 }
 0x326   :  { %3340 = vrcp.f32 %v2350_v25 }
 0x327   :  { %3342 = vrcp.f32 %v2351_v26 }
 0x328   :  { %v3333_v27 = vpop.eup %3332 }
 0x329   :  { %v3335_v28 = vpop.eup %3334  ;;  %2538 = vst [vmem:[%s4235_s4 + $0x1d0] sm:$0xff] %v3333_v27 }
 0x32a   :  { %v3337_v29 = vpop.eup %3336  ;;  %2539 = vst [vmem:[%s4235_s4 + $0x1d8] sm:$0xff] %v3335_v28 }
 0x32b   :  { %v3339_v30 = vpop.eup %3338  ;;  %2540 = vst [vmem:[%s4235_s4 + $0x1e0] sm:$0xff] %v3337_v29 }
 0x32c   :  { %2541 = vst [vmem:[%s4235_s4 + $0x1e8] sm:$0xff] %v3339_v30 }
 0x330   :  { %v3341_v31 = vpop.eup %3340 }
 0x331   :  { %v3343_v32 = vpop.eup %3342  ;;  %2542 = vst [vmem:[%s4235_s4 + $0x1f0] sm:$0xff] %v3341_v31 }
 0x332   :  { %2543 = vst [vmem:[%s4235_s4 + $0x1f8] sm:$0xff] %v3343_v32 }
 0x333   :  { %2552 = vsyncpa [#allocation3], 1 }
 0x334   :  { %2553 = vsyncpa [#allocation5], 1 }

</bundles_post_ra>
